<compile_context>
chip_gen: v7x
topology: tpu7x:2x2x1
jax: 0.10.0
libtpu: 0.0.40
codegen_flags: <defaults>
</compile_context>

<pallas_src>
import functools

import jax
import jax.numpy as jnp
import numpy as np
from jax import lax
from jax.experimental import pallas as pl
from jax.experimental.pallas import tpu as pltpu


def _conv3x3_flat(x, w_ref, line_ref, mask_l, mask_r, wo, pad):
    """3x3 'SAME' convolution on a flattened (Ho*Wo, C_in) image.

    x        : (R, C_in) register value, R = Ho*Wo (row-major y*Wo + x)
    w_ref    : (3, 3, C_in, C_out) VMEM ref (BN scale already folded in)
    line_ref : (R + 2*pad, C_in) VMEM flat line buffer, pad = Wo + 1
    mask_l/r : (R, 1) bool -- pixel has a valid left / right neighbour
    Returns a (R, C_out) f32 accumulator (no bias / activation applied).
    """
    r = x.shape[0]
    c_in = x.shape[1]
    c_out = w_ref.shape[3]

    # Zero only the halo (2*(Wo+1) rows), not the whole buffer; the interior is
    # fully overwritten every call.
    line_ref[pl.ds(0, pad), :] = jnp.zeros((pad, c_in), jnp.float32)
    line_ref[pl.ds(pad + r, pad), :] = jnp.zeros((pad, c_in), jnp.float32)
    line_ref[pl.ds(pad, r), :] = x

    acc = jnp.zeros((r, c_out), jnp.float32)
    for ox, mask in ((-1, mask_l), (0, None), (1, mask_r)):
        part = jnp.zeros((r, c_out), jnp.float32)
        for oy in (-1, 0, 1):
            shift = oy * wo + ox
            tap = line_ref[pl.ds(pad + shift, r), :]            # (R, C_in)
            part += jnp.dot(tap, w_ref[oy + 1, ox + 1],
                            preferred_element_type=jnp.float32)
        # Per-pixel row mask is constant across the contracted channel axis, so
        # it commutes with the matmul: apply once per column-offset group.
        acc += part if mask is None else jnp.where(mask, part, 0.0)
    return acc


def _down_kernel(x_ref, w1_ref, t1_ref, w2_ref, t2_ref, o_ref,
                 line1_ref, line2_ref, *, wo):
    """One batch element per grid step.

    x_ref  : (1, 4, R, Cin)   -- axis 1 is the pre-split 2x2 pool window
    w*_ref : (3, 3, C_in, C_out) conv weights with the BN scale folded in
    t*_ref : (1, C_out)          folded conv-bias + BN shift
    o_ref  : (1, R, Cout)
    line*_ref : flat zero-padded VMEM line buffers (see _conv3x3_flat)
    """
    r = x_ref.shape[2]
    pad = wo + 1

    # ---- MaxPool 2x2: reduction over the pre-split window axis ----
    pooled = jnp.max(x_ref[0], axis=0)                          # (R, Cin)

    # Column-validity masks (shared by both convs).
    col = lax.broadcasted_iota(jnp.int32, (r, 1), 0) % wo
    mask_l = col >= 1                 # has a valid left neighbour  (ox = -1)
    mask_r = col < (wo - 1)           # has a valid right neighbour (ox = +1)

    # ---- Conv1 + (folded bias/BN) + ReLU ----
    acc1 = _conv3x3_flat(pooled, w1_ref, line1_ref, mask_l, mask_r, wo, pad)
    h1 = jnp.maximum(acc1 + t1_ref[...], 0.0)

    # ---- Conv2 + (folded bias/BN) + ReLU ----
    acc2 = _conv3x3_flat(h1, w2_ref, line2_ref, mask_l, mask_r, wo, pad)
    h2 = jnp.maximum(acc2 + t2_ref[...], 0.0)

    # NOTE: with tiny Cout this store is lane-sparse; at production channel
    # counts (>=128) it is lane-dense with no extra in-kernel relayout.
    o_ref[0] = h2


@jax.jit
def down_forward(x_nchw, params):
    """Pallas implementation of `down.forward` (eval-mode BN).  NCHW in/out."""
    N, Cin, H, W = x_nchw.shape
    Ho, Wo = H // 2, W // 2
    R = Ho * Wo
    Cout = params["w1"].shape[-1]
    eps = 1e-5

    # MaxPool2d(2) floors odd spatial dims, like PyTorch.
    x = x_nchw[:, :, :2 * Ho, :2 * Wo]

    # Single fused HBM rearrangement pass:
    # NCHW -> (N, 4, Ho*Wo, Cin), axis 1 enumerating the 2x2 pool window
    # (one real transpose between two bitcast reshapes).
    xw = (x.reshape(N, Cin, Ho, 2, Wo, 2)
            .transpose(0, 3, 5, 2, 4, 1)
            .reshape(N, 4, R, Cin))

    # Fold conv bias + eval-mode BN into the weights and a per-channel shift:
    #   (conv(x, w) + b) * s + (be - m*s)  ==  conv(x, w*s) + (b*s + be - m*s)
    def fold(w, b, g, be, m, v):
        s = g / jnp.sqrt(v + eps)
        return w * s[None, None, None, :], (b * s + be - m * s).reshape(1, -1)

    w1f, t1 = fold(params["w1"], params["b1"], params["g1"], params["be1"],
                   params["m1"], params["v1"])
    w2f, t2 = fold(params["w2"], params["b2"], params["g2"], params["be2"],
                   params["m2"], params["v2"])

    full = lambda shape: pl.BlockSpec(shape, lambda n: (0,) * len(shape))

    out_flat = pl.pallas_call(
        functools.partial(_down_kernel, wo=Wo),
        out_shape=jax.ShapeDtypeStruct((N, R, Cout), jnp.float32),
        grid=(N,),
        in_specs=[
            pl.BlockSpec((1, 4, R, Cin), lambda n: (n, 0, 0, 0)),
            full((3, 3, Cin, Cout)),     # w1 (BN scale folded in)
            full((1, Cout)),             # t1 (bias + BN shift)
            full((3, 3, Cout, Cout)),    # w2 (BN scale folded in)
            full((1, Cout)),             # t2 (bias + BN shift)
        ],
        out_specs=pl.BlockSpec((1, R, Cout), lambda n: (n, 0, 0)),
        scratch_shapes=[
            pltpu.VMEM((R + 2 * (Wo + 1), Cin), jnp.float32),
            pltpu.VMEM((R + 2 * (Wo + 1), Cout), jnp.float32),
        ],
        compiler_params=pltpu.CompilerParams(
            dimension_semantics=("parallel",),
            vmem_limit_bytes=32 * 1024 * 1024),
    )(xw, w1f, t1, w2f, t2)

    # (N, Ho*Wo, Cout) -> NCHW
    return out_flat.reshape(N, Ho, Wo, Cout).transpose(0, 3, 1, 2)


def ref_forward(x_nchw, params):
    """Pure-JAX reference (lax conv / reduce_window), NCHW in/out."""
    eps = 1e-5
    x = jnp.transpose(x_nchw, (0, 2, 3, 1))                              # NHWC
    p = lax.reduce_window(x, -jnp.inf, lax.max,
                          (1, 2, 2, 1), (1, 2, 2, 1), "VALID")

    def block(h, w, b, g, be, m, v):
        h = lax.conv_general_dilated(
            h, w, (1, 1), "SAME",
            dimension_numbers=("NHWC", "HWIO", "NHWC")) + b.reshape(1, 1, 1, -1)
        s = g / jnp.sqrt(v + eps)
        t = be - m * s
        h = h * s.reshape(1, 1, 1, -1) + t.reshape(1, 1, 1, -1)
        return jnp.maximum(h, 0.0)

    h = block(p, params["w1"], params["b1"], params["g1"], params["be1"],
              params["m1"], params["v1"])
    h = block(h, params["w2"], params["b2"], params["g2"], params["be2"],
              params["m2"], params["v2"])
    return jnp.transpose(h, (0, 3, 1, 2))


def init_params(key, in_ch, out_ch):
    ks = jax.random.split(key, 10)
    f32 = jnp.float32
    return {
        # conv weights stored HWIO: (3, 3, C_in, C_out)
        "w1": jax.random.normal(ks[0], (3, 3, in_ch, out_ch), f32) * 0.1,
        "b1": jax.random.normal(ks[1], (out_ch,), f32) * 0.05,
        "g1": 1.0 + 0.1 * jax.random.normal(ks[2], (out_ch,), f32),
        "be1": 0.05 * jax.random.normal(ks[3], (out_ch,), f32),
        "m1": 0.05 * jax.random.normal(ks[4], (out_ch,), f32),
        "v1": 1.0 + 0.1 * jax.nn.softplus(jax.random.normal(ks[5], (out_ch,), f32)),
        "w2": jax.random.normal(ks[6], (3, 3, out_ch, out_ch), f32) * 0.1,
        "b2": jax.random.normal(ks[7], (out_ch,), f32) * 0.05,
        "g2": 1.0 + 0.1 * jax.random.normal(ks[8], (out_ch,), f32),
        "be2": 0.05 * jax.random.normal(ks[9], (out_ch,), f32),
        "m2": jnp.zeros((out_ch,), f32),
        "v2": jnp.ones((out_ch,), f32),
    }


if __name__ == "__main__":
    N, in_ch, out_ch, H, W = 2, 4, 8, 16, 16

    key = jax.random.PRNGKey(0)
    kx, kp = jax.random.split(key)
    x = jax.random.normal(kx, (N, in_ch, H, W), jnp.float32)   # NCHW, like PyTorch
    params = init_params(kp, in_ch, out_ch)

    out = down_forward(x, params)
    out = jax.block_until_ready(out)

    ref = ref_forward(x, params)
    assert out.shape == (N, out_ch, H // 2, W // 2), out.shape
    np.testing.assert_allclose(np.asarray(out), np.asarray(ref),
                               rtol=1e-4, atol=1e-4)
    print("KERNEL_OK")
</pallas_src>

<mosaic_0001>
module attributes {stable_mosaic.version = 11 : i64} {
  func.func @_down_kernel(%arg0: i32, %arg1: memref<1x4x64x4xf32, #tpu.memory_space<vmem>>, %arg2: memref<3x3x4x8xf32, #tpu.memory_space<vmem>>, %arg3: memref<1x8xf32, #tpu.memory_space<vmem>>, %arg4: memref<3x3x8x8xf32, #tpu.memory_space<vmem>>, %arg5: memref<1x8xf32, #tpu.memory_space<vmem>>, %arg6: memref<1x64x8xf32, #tpu.memory_space<vmem>>, %arg7: memref<82x4xf32, #tpu.memory_space<vmem>>, %arg8: memref<82x8xf32, #tpu.memory_space<vmem>>) attributes {dimension_semantics = [#tpu.dimension_semantics<parallel>], iteration_bounds = array<i64: 2>, scalar_prefetch = 0 : i64, scratch_operands = 2 : i64, tpu.core_type = #tpu.core_type<tc>, window_params = [{transform_indices = @transform_0, window_bounds = array<i64: 1, 4, 64, 4>}, {pipeline_mode = #tpu.pipeline_mode<synchronous>, transform_indices = @transform_1, window_bounds = array<i64: 3, 3, 4, 8>}, {pipeline_mode = #tpu.pipeline_mode<synchronous>, transform_indices = @transform_2, window_bounds = array<i64: 1, 8>}, {pipeline_mode = #tpu.pipeline_mode<synchronous>, transform_indices = @transform_3, window_bounds = array<i64: 3, 3, 8, 8>}, {pipeline_mode = #tpu.pipeline_mode<synchronous>, transform_indices = @transform_4, window_bounds = array<i64: 1, 8>}, {transform_indices = @transform_5, window_bounds = array<i64: 1, 64, 8>}]} {
    %c0 = arith.constant 0 : index
    %c0_0 = arith.constant 0 : index
    %c0_1 = arith.constant 0 : index
    %c0_2 = arith.constant 0 : index
    %0 = vector.load %arg1[%c0, %c0_0, %c0_1, %c0_2] : memref<1x4x64x4xf32, #tpu.memory_space<vmem>>, vector<1x4x64x4xf32>
    %1 = vector.shape_cast %0 : vector<1x4x64x4xf32> to vector<4x64x4xf32>
    %cst = arith.constant dense<0xFF800000> : vector<64x4xf32>
    %2 = vector.multi_reduction <maximumf>, %1, %cst [0] : vector<4x64x4xf32> to vector<64x4xf32>
    %3 = tpu.iota {dimensions = array<i32: 0>} : vector<64x1xi32>
    %c8_i32 = arith.constant 8 : i32
    %c0_i32 = arith.constant 0 : i32
    %4 = arith.cmpi eq, %c8_i32, %c0_i32 : i32
    %c1_i32 = arith.constant 1 : i32
    %5 = arith.select %4, %c1_i32, %c8_i32 : i32
    %6 = vector.broadcast %5 : i32 to vector<64x1xi32>
    %7 = arith.remsi %3, %6 : vector<64x1xi32>
    %c0_i32_3 = arith.constant 0 : i32
    %8 = vector.broadcast %c0_i32_3 : i32 to vector<64x1xi32>
    %9 = arith.cmpi ne, %7, %8 : vector<64x1xi32>
    %c0_i32_4 = arith.constant 0 : i32
    %10 = vector.broadcast %c0_i32_4 : i32 to vector<64x1xi32>
    %11 = arith.cmpi slt, %7, %10 : vector<64x1xi32>
    %c0_i32_5 = arith.constant 0 : i32
    %12 = arith.cmpi slt, %5, %c0_i32_5 : i32
    %13 = vector.broadcast %12 : i1 to vector<64x1xi1>
    %14 = vector.broadcast %13 : vector<64x1xi1> to vector<64x1xi1>
    %15 = arith.xori %11, %14 : vector<64x1xi1>
    %16 = arith.andi %15, %9 : vector<64x1xi1>
    %17 = vector.broadcast %5 : i32 to vector<64x1xi32>
    %18 = arith.addi %7, %17 : vector<64x1xi32>
    %19 = arith.select %16, %18, %7 : vector<64x1xi1>, vector<64x1xi32>
    %c1_i32_6 = arith.constant 1 : i32
    %20 = vector.broadcast %c1_i32_6 : i32 to vector<64x1xi32>
    %21 = arith.cmpi sge, %19, %20 : vector<64x1xi32>
    %c7_i32 = arith.constant 7 : i32
    %22 = vector.broadcast %c7_i32 : i32 to vector<64x1xi32>
    %23 = arith.cmpi slt, %19, %22 : vector<64x1xi32>
    %cst_7 = arith.constant 0.000000e+00 : f32
    %24 = vector.broadcast %cst_7 : f32 to vector<9x4xf32>
    %c0_8 = arith.constant 0 : index
    %c0_9 = arith.constant 0 : index
    %25 = vector.load %arg7[%c0_8, %c0_9] : memref<82x4xf32, #tpu.memory_space<vmem>>, vector<9x4xf32>
    tpu.vector_store %arg7[%c0_8, %c0_9], %24 {strides = array<i32>} : memref<82x4xf32, #tpu.memory_space<vmem>>, vector<9x4xf32>,
    %cst_10 = arith.constant 0.000000e+00 : f32
    %26 = vector.broadcast %cst_10 : f32 to vector<9x4xf32>
    %c73 = arith.constant 73 : index
    %c0_11 = arith.constant 0 : index
    %27 = vector.load %arg7[%c73, %c0_11] : memref<82x4xf32, #tpu.memory_space<vmem>>, vector<9x4xf32>
    tpu.vector_store %arg7[%c73, %c0_11], %26 {strides = array<i32>} : memref<82x4xf32, #tpu.memory_space<vmem>>, vector<9x4xf32>,
    %c9 = arith.constant 9 : index
    %c0_12 = arith.constant 0 : index
    %28 = vector.load %arg7[%c9, %c0_12] : memref<82x4xf32, #tpu.memory_space<vmem>>, vector<64x4xf32>
    tpu.vector_store %arg7[%c9, %c0_12], %2 {strides = array<i32>} : memref<82x4xf32, #tpu.memory_space<vmem>>, vector<64x4xf32>,
    %cst_13 = arith.constant 0.000000e+00 : f32
    %29 = vector.broadcast %cst_13 : f32 to vector<64x8xf32>
    %cst_14 = arith.constant 0.000000e+00 : f32
    %30 = vector.broadcast %cst_14 : f32 to vector<64x8xf32>
    %c0_15 = arith.constant 0 : index
    %c0_16 = arith.constant 0 : index
    %31 = vector.load %arg7[%c0_15, %c0_16] : memref<82x4xf32, #tpu.memory_space<vmem>>, vector<64x4xf32>
    %c0_17 = arith.constant 0 : index
    %c0_18 = arith.constant 0 : index
    %c0_19 = arith.constant 0 : index
    %c0_20 = arith.constant 0 : index
    %32 = vector.load %arg2[%c0_17, %c0_18, %c0_19, %c0_20] : memref<3x3x4x8xf32, #tpu.memory_space<vmem>>, vector<1x1x4x8xf32>
    %33 = vector.shape_cast %32 : vector<1x1x4x8xf32> to vector<4x8xf32>
    %cst_21 = arith.constant dense<0.000000e+00> : vector<64x8xf32>
    %34 = tpu.matmul %31, %33, %cst_21 {dimension_numbers = #tpu.dot_dimension_numbers<[1], [0], [0], [1], [0, 0, 1, 1], [], []>} : vector<64x4xf32>, vector<4x8xf32>, vector<64x8xf32> -> vector<64x8xf32>
    %35 = arith.addf %30, %34 : vector<64x8xf32>
    %c8 = arith.constant 8 : index
    %c0_22 = arith.constant 0 : index
    %36 = vector.load %arg7[%c8, %c0_22] : memref<82x4xf32, #tpu.memory_space<vmem>>, vector<64x4xf32>
    %c1 = arith.constant 1 : index
    %c0_23 = arith.constant 0 : index
    %c0_24 = arith.constant 0 : index
    %c0_25 = arith.constant 0 : index
    %37 = vector.load %arg2[%c1, %c0_23, %c0_24, %c0_25] : memref<3x3x4x8xf32, #tpu.memory_space<vmem>>, vector<1x1x4x8xf32>
    %38 = vector.shape_cast %37 : vector<1x1x4x8xf32> to vector<4x8xf32>
    %cst_26 = arith.constant dense<0.000000e+00> : vector<64x8xf32>
    %39 = tpu.matmul %36, %38, %cst_26 {dimension_numbers = #tpu.dot_dimension_numbers<[1], [0], [0], [1], [0, 0, 1, 1], [], []>} : vector<64x4xf32>, vector<4x8xf32>, vector<64x8xf32> -> vector<64x8xf32>
    %40 = arith.addf %35, %39 : vector<64x8xf32>
    %c16 = arith.constant 16 : index
    %c0_27 = arith.constant 0 : index
    %41 = vector.load %arg7[%c16, %c0_27] : memref<82x4xf32, #tpu.memory_space<vmem>>, vector<64x4xf32>
    %c2 = arith.constant 2 : index
    %c0_28 = arith.constant 0 : index
    %c0_29 = arith.constant 0 : index
    %c0_30 = arith.constant 0 : index
    %42 = vector.load %arg2[%c2, %c0_28, %c0_29, %c0_30] : memref<3x3x4x8xf32, #tpu.memory_space<vmem>>, vector<1x1x4x8xf32>
    %43 = vector.shape_cast %42 : vector<1x1x4x8xf32> to vector<4x8xf32>
    %cst_31 = arith.constant dense<0.000000e+00> : vector<64x8xf32>
    %44 = tpu.matmul %41, %43, %cst_31 {dimension_numbers = #tpu.dot_dimension_numbers<[1], [0], [0], [1], [0, 0, 1, 1], [], []>} : vector<64x4xf32>, vector<4x8xf32>, vector<64x8xf32> -> vector<64x8xf32>
    %45 = arith.addf %40, %44 : vector<64x8xf32>
    %cst_32 = arith.constant 0.000000e+00 : f32
    %46 = vector.shape_cast %21 : vector<64x1xi1> to vector<64x1xi1>
    %47 = vector.broadcast %46 : vector<64x1xi1> to vector<64x8xi1>
    %48 = vector.broadcast %cst_32 : f32 to vector<64x8xf32>
    %49 = arith.select %47, %45, %48 : vector<64x8xi1>, vector<64x8xf32>
    %50 = arith.addf %29, %49 : vector<64x8xf32>
    %cst_33 = arith.constant 0.000000e+00 : f32
    %51 = vector.broadcast %cst_33 : f32 to vector<64x8xf32>
    %c1_34 = arith.constant 1 : index
    %c0_35 = arith.constant 0 : index
    %52 = vector.load %arg7[%c1_34, %c0_35] : memref<82x4xf32, #tpu.memory_space<vmem>>, vector<64x4xf32>
    %c0_36 = arith.constant 0 : index
    %c1_37 = arith.constant 1 : index
    %c0_38 = arith.constant 0 : index
    %c0_39 = arith.constant 0 : index
    %53 = vector.load %arg2[%c0_36, %c1_37, %c0_38, %c0_39] : memref<3x3x4x8xf32, #tpu.memory_space<vmem>>, vector<1x1x4x8xf32>
    %54 = vector.shape_cast %53 : vector<1x1x4x8xf32> to vector<4x8xf32>
    %cst_40 = arith.constant dense<0.000000e+00> : vector<64x8xf32>
    %55 = tpu.matmul %52, %54, %cst_40 {dimension_numbers = #tpu.dot_dimension_numbers<[1], [0], [0], [1], [0, 0, 1, 1], [], []>} : vector<64x4xf32>, vector<4x8xf32>, vector<64x8xf32> -> vector<64x8xf32>
    %56 = arith.addf %51, %55 : vector<64x8xf32>
    %c9_41 = arith.constant 9 : index
    %c0_42 = arith.constant 0 : index
    %57 = vector.load %arg7[%c9_41, %c0_42] : memref<82x4xf32, #tpu.memory_space<vmem>>, vector<64x4xf32>
    %c1_43 = arith.constant 1 : index
    %c1_44 = arith.constant 1 : index
    %c0_45 = arith.constant 0 : index
    %c0_46 = arith.constant 0 : index
    %58 = vector.load %arg2[%c1_43, %c1_44, %c0_45, %c0_46] : memref<3x3x4x8xf32, #tpu.memory_space<vmem>>, vector<1x1x4x8xf32>
    %59 = vector.shape_cast %58 : vector<1x1x4x8xf32> to vector<4x8xf32>
    %cst_47 = arith.constant dense<0.000000e+00> : vector<64x8xf32>
    %60 = tpu.matmul %57, %59, %cst_47 {dimension_numbers = #tpu.dot_dimension_numbers<[1], [0], [0], [1], [0, 0, 1, 1], [], []>} : vector<64x4xf32>, vector<4x8xf32>, vector<64x8xf32> -> vector<64x8xf32>
    %61 = arith.addf %56, %60 : vector<64x8xf32>
    %c17 = arith.constant 17 : index
    %c0_48 = arith.constant 0 : index
    %62 = vector.load %arg7[%c17, %c0_48] : memref<82x4xf32, #tpu.memory_space<vmem>>, vector<64x4xf32>
    %c2_49 = arith.constant 2 : index
    %c1_50 = arith.constant 1 : index
    %c0_51 = arith.constant 0 : index
    %c0_52 = arith.constant 0 : index
    %63 = vector.load %arg2[%c2_49, %c1_50, %c0_51, %c0_52] : memref<3x3x4x8xf32, #tpu.memory_space<vmem>>, vector<1x1x4x8xf32>
    %64 = vector.shape_cast %63 : vector<1x1x4x8xf32> to vector<4x8xf32>
    %cst_53 = arith.constant dense<0.000000e+00> : vector<64x8xf32>
    %65 = tpu.matmul %62, %64, %cst_53 {dimension_numbers = #tpu.dot_dimension_numbers<[1], [0], [0], [1], [0, 0, 1, 1], [], []>} : vector<64x4xf32>, vector<4x8xf32>, vector<64x8xf32> -> vector<64x8xf32>
    %66 = arith.addf %61, %65 : vector<64x8xf32>
    %67 = arith.addf %50, %66 : vector<64x8xf32>
    %cst_54 = arith.constant 0.000000e+00 : f32
    %68 = vector.broadcast %cst_54 : f32 to vector<64x8xf32>
    %c2_55 = arith.constant 2 : index
    %c0_56 = arith.constant 0 : index
    %69 = vector.load %arg7[%c2_55, %c0_56] : memref<82x4xf32, #tpu.memory_space<vmem>>, vector<64x4xf32>
    %c0_57 = arith.constant 0 : index
    %c2_58 = arith.constant 2 : index
    %c0_59 = arith.constant 0 : index
    %c0_60 = arith.constant 0 : index
    %70 = vector.load %arg2[%c0_57, %c2_58, %c0_59, %c0_60] : memref<3x3x4x8xf32, #tpu.memory_space<vmem>>, vector<1x1x4x8xf32>
    %71 = vector.shape_cast %70 : vector<1x1x4x8xf32> to vector<4x8xf32>
    %cst_61 = arith.constant dense<0.000000e+00> : vector<64x8xf32>
    %72 = tpu.matmul %69, %71, %cst_61 {dimension_numbers = #tpu.dot_dimension_numbers<[1], [0], [0], [1], [0, 0, 1, 1], [], []>} : vector<64x4xf32>, vector<4x8xf32>, vector<64x8xf32> -> vector<64x8xf32>
    %73 = arith.addf %68, %72 : vector<64x8xf32>
    %c10 = arith.constant 10 : index
    %c0_62 = arith.constant 0 : index
    %74 = vector.load %arg7[%c10, %c0_62] : memref<82x4xf32, #tpu.memory_space<vmem>>, vector<64x4xf32>
    %c1_63 = arith.constant 1 : index
    %c2_64 = arith.constant 2 : index
    %c0_65 = arith.constant 0 : index
    %c0_66 = arith.constant 0 : index
    %75 = vector.load %arg2[%c1_63, %c2_64, %c0_65, %c0_66] : memref<3x3x4x8xf32, #tpu.memory_space<vmem>>, vector<1x1x4x8xf32>
    %76 = vector.shape_cast %75 : vector<1x1x4x8xf32> to vector<4x8xf32>
    %cst_67 = arith.constant dense<0.000000e+00> : vector<64x8xf32>
    %77 = tpu.matmul %74, %76, %cst_67 {dimension_numbers = #tpu.dot_dimension_numbers<[1], [0], [0], [1], [0, 0, 1, 1], [], []>} : vector<64x4xf32>, vector<4x8xf32>, vector<64x8xf32> -> vector<64x8xf32>
    %78 = arith.addf %73, %77 : vector<64x8xf32>
    %c18 = arith.constant 18 : index
    %c0_68 = arith.constant 0 : index
    %79 = vector.load %arg7[%c18, %c0_68] : memref<82x4xf32, #tpu.memory_space<vmem>>, vector<64x4xf32>
    %c2_69 = arith.constant 2 : index
    %c2_70 = arith.constant 2 : index
    %c0_71 = arith.constant 0 : index
    %c0_72 = arith.constant 0 : index
    %80 = vector.load %arg2[%c2_69, %c2_70, %c0_71, %c0_72] : memref<3x3x4x8xf32, #tpu.memory_space<vmem>>, vector<1x1x4x8xf32>
    %81 = vector.shape_cast %80 : vector<1x1x4x8xf32> to vector<4x8xf32>
    %cst_73 = arith.constant dense<0.000000e+00> : vector<64x8xf32>
    %82 = tpu.matmul %79, %81, %cst_73 {dimension_numbers = #tpu.dot_dimension_numbers<[1], [0], [0], [1], [0, 0, 1, 1], [], []>} : vector<64x4xf32>, vector<4x8xf32>, vector<64x8xf32> -> vector<64x8xf32>
    %83 = arith.addf %78, %82 : vector<64x8xf32>
    %cst_74 = arith.constant 0.000000e+00 : f32
    %84 = vector.shape_cast %23 : vector<64x1xi1> to vector<64x1xi1>
    %85 = vector.broadcast %84 : vector<64x1xi1> to vector<64x8xi1>
    %86 = vector.broadcast %cst_74 : f32 to vector<64x8xf32>
    %87 = arith.select %85, %83, %86 : vector<64x8xi1>, vector<64x8xf32>
    %88 = arith.addf %67, %87 : vector<64x8xf32>
    %c0_75 = arith.constant 0 : index
    %c0_76 = arith.constant 0 : index
    %89 = vector.load %arg3[%c0_75, %c0_76] : memref<1x8xf32, #tpu.memory_space<vmem>>, vector<1x8xf32>
    %90 = vector.broadcast %89 : vector<1x8xf32> to vector<64x8xf32>
    %91 = arith.addf %88, %90 : vector<64x8xf32>
    %cst_77 = arith.constant 0.000000e+00 : f32
    %92 = vector.broadcast %cst_77 : f32 to vector<64x8xf32>
    %93 = arith.maximumf %91, %92 : vector<64x8xf32>
    %cst_78 = arith.constant 0.000000e+00 : f32
    %94 = vector.broadcast %cst_78 : f32 to vector<9x8xf32>
    %c0_79 = arith.constant 0 : index
    %c0_80 = arith.constant 0 : index
    %95 = vector.load %arg8[%c0_79, %c0_80] : memref<82x8xf32, #tpu.memory_space<vmem>>, vector<9x8xf32>
    tpu.vector_store %arg8[%c0_79, %c0_80], %94 {strides = array<i32>} : memref<82x8xf32, #tpu.memory_space<vmem>>, vector<9x8xf32>,
    %cst_81 = arith.constant 0.000000e+00 : f32
    %96 = vector.broadcast %cst_81 : f32 to vector<9x8xf32>
    %c73_82 = arith.constant 73 : index
    %c0_83 = arith.constant 0 : index
    %97 = vector.load %arg8[%c73_82, %c0_83] : memref<82x8xf32, #tpu.memory_space<vmem>>, vector<9x8xf32>
    tpu.vector_store %arg8[%c73_82, %c0_83], %96 {strides = array<i32>} : memref<82x8xf32, #tpu.memory_space<vmem>>, vector<9x8xf32>,
    %c9_84 = arith.constant 9 : index
    %c0_85 = arith.constant 0 : index
    %98 = vector.load %arg8[%c9_84, %c0_85] : memref<82x8xf32, #tpu.memory_space<vmem>>, vector<64x8xf32>
    tpu.vector_store %arg8[%c9_84, %c0_85], %93 {strides = array<i32>} : memref<82x8xf32, #tpu.memory_space<vmem>>, vector<64x8xf32>,
    %cst_86 = arith.constant 0.000000e+00 : f32
    %99 = vector.broadcast %cst_86 : f32 to vector<64x8xf32>
    %cst_87 = arith.constant 0.000000e+00 : f32
    %100 = vector.broadcast %cst_87 : f32 to vector<64x8xf32>
    %c0_88 = arith.constant 0 : index
    %c0_89 = arith.constant 0 : index
    %101 = vector.load %arg8[%c0_88, %c0_89] : memref<82x8xf32, #tpu.memory_space<vmem>>, vector<64x8xf32>
    %c0_90 = arith.constant 0 : index
    %c0_91 = arith.constant 0 : index
    %c0_92 = arith.constant 0 : index
    %c0_93 = arith.constant 0 : index
    %102 = vector.load %arg4[%c0_90, %c0_91, %c0_92, %c0_93] : memref<3x3x8x8xf32, #tpu.memory_space<vmem>>, vector<1x1x8x8xf32>
    %103 = vector.shape_cast %102 : vector<1x1x8x8xf32> to vector<8x8xf32>
    %cst_94 = arith.constant dense<0.000000e+00> : vector<64x8xf32>
    %104 = tpu.matmul %101, %103, %cst_94 {dimension_numbers = #tpu.dot_dimension_numbers<[1], [0], [0], [1], [0, 0, 1, 1], [], []>} : vector<64x8xf32>, vector<8x8xf32>, vector<64x8xf32> -> vector<64x8xf32>
    %105 = arith.addf %100, %104 : vector<64x8xf32>
    %c8_95 = arith.constant 8 : index
    %c0_96 = arith.constant 0 : index
    %106 = vector.load %arg8[%c8_95, %c0_96] : memref<82x8xf32, #tpu.memory_space<vmem>>, vector<64x8xf32>
    %c1_97 = arith.constant 1 : index
    %c0_98 = arith.constant 0 : index
    %c0_99 = arith.constant 0 : index
    %c0_100 = arith.constant 0 : index
    %107 = vector.load %arg4[%c1_97, %c0_98, %c0_99, %c0_100] : memref<3x3x8x8xf32, #tpu.memory_space<vmem>>, vector<1x1x8x8xf32>
    %108 = vector.shape_cast %107 : vector<1x1x8x8xf32> to vector<8x8xf32>
    %cst_101 = arith.constant dense<0.000000e+00> : vector<64x8xf32>
    %109 = tpu.matmul %106, %108, %cst_101 {dimension_numbers = #tpu.dot_dimension_numbers<[1], [0], [0], [1], [0, 0, 1, 1], [], []>} : vector<64x8xf32>, vector<8x8xf32>, vector<64x8xf32> -> vector<64x8xf32>
    %110 = arith.addf %105, %109 : vector<64x8xf32>
    %c16_102 = arith.constant 16 : index
    %c0_103 = arith.constant 0 : index
    %111 = vector.load %arg8[%c16_102, %c0_103] : memref<82x8xf32, #tpu.memory_space<vmem>>, vector<64x8xf32>
    %c2_104 = arith.constant 2 : index
    %c0_105 = arith.constant 0 : index
    %c0_106 = arith.constant 0 : index
    %c0_107 = arith.constant 0 : index
    %112 = vector.load %arg4[%c2_104, %c0_105, %c0_106, %c0_107] : memref<3x3x8x8xf32, #tpu.memory_space<vmem>>, vector<1x1x8x8xf32>
    %113 = vector.shape_cast %112 : vector<1x1x8x8xf32> to vector<8x8xf32>
    %cst_108 = arith.constant dense<0.000000e+00> : vector<64x8xf32>
    %114 = tpu.matmul %111, %113, %cst_108 {dimension_numbers = #tpu.dot_dimension_numbers<[1], [0], [0], [1], [0, 0, 1, 1], [], []>} : vector<64x8xf32>, vector<8x8xf32>, vector<64x8xf32> -> vector<64x8xf32>
    %115 = arith.addf %110, %114 : vector<64x8xf32>
    %cst_109 = arith.constant 0.000000e+00 : f32
    %116 = vector.shape_cast %21 : vector<64x1xi1> to vector<64x1xi1>
    %117 = vector.broadcast %116 : vector<64x1xi1> to vector<64x8xi1>
    %118 = vector.broadcast %cst_109 : f32 to vector<64x8xf32>
    %119 = arith.select %117, %115, %118 : vector<64x8xi1>, vector<64x8xf32>
    %120 = arith.addf %99, %119 : vector<64x8xf32>
    %cst_110 = arith.constant 0.000000e+00 : f32
    %121 = vector.broadcast %cst_110 : f32 to vector<64x8xf32>
    %c1_111 = arith.constant 1 : index
    %c0_112 = arith.constant 0 : index
    %122 = vector.load %arg8[%c1_111, %c0_112] : memref<82x8xf32, #tpu.memory_space<vmem>>, vector<64x8xf32>
    %c0_113 = arith.constant 0 : index
    %c1_114 = arith.constant 1 : index
    %c0_115 = arith.constant 0 : index
    %c0_116 = arith.constant 0 : index
    %123 = vector.load %arg4[%c0_113, %c1_114, %c0_115, %c0_116] : memref<3x3x8x8xf32, #tpu.memory_space<vmem>>, vector<1x1x8x8xf32>
    %124 = vector.shape_cast %123 : vector<1x1x8x8xf32> to vector<8x8xf32>
    %cst_117 = arith.constant dense<0.000000e+00> : vector<64x8xf32>
    %125 = tpu.matmul %122, %124, %cst_117 {dimension_numbers = #tpu.dot_dimension_numbers<[1], [0], [0], [1], [0, 0, 1, 1], [], []>} : vector<64x8xf32>, vector<8x8xf32>, vector<64x8xf32> -> vector<64x8xf32>
    %126 = arith.addf %121, %125 : vector<64x8xf32>
    %c9_118 = arith.constant 9 : index
    %c0_119 = arith.constant 0 : index
    %127 = vector.load %arg8[%c9_118, %c0_119] : memref<82x8xf32, #tpu.memory_space<vmem>>, vector<64x8xf32>
    %c1_120 = arith.constant 1 : index
    %c1_121 = arith.constant 1 : index
    %c0_122 = arith.constant 0 : index
    %c0_123 = arith.constant 0 : index
    %128 = vector.load %arg4[%c1_120, %c1_121, %c0_122, %c0_123] : memref<3x3x8x8xf32, #tpu.memory_space<vmem>>, vector<1x1x8x8xf32>
    %129 = vector.shape_cast %128 : vector<1x1x8x8xf32> to vector<8x8xf32>
    %cst_124 = arith.constant dense<0.000000e+00> : vector<64x8xf32>
    %130 = tpu.matmul %127, %129, %cst_124 {dimension_numbers = #tpu.dot_dimension_numbers<[1], [0], [0], [1], [0, 0, 1, 1], [], []>} : vector<64x8xf32>, vector<8x8xf32>, vector<64x8xf32> -> vector<64x8xf32>
    %131 = arith.addf %126, %130 : vector<64x8xf32>
    %c17_125 = arith.constant 17 : index
    %c0_126 = arith.constant 0 : index
    %132 = vector.load %arg8[%c17_125, %c0_126] : memref<82x8xf32, #tpu.memory_space<vmem>>, vector<64x8xf32>
    %c2_127 = arith.constant 2 : index
    %c1_128 = arith.constant 1 : index
    %c0_129 = arith.constant 0 : index
    %c0_130 = arith.constant 0 : index
    %133 = vector.load %arg4[%c2_127, %c1_128, %c0_129, %c0_130] : memref<3x3x8x8xf32, #tpu.memory_space<vmem>>, vector<1x1x8x8xf32>
    %134 = vector.shape_cast %133 : vector<1x1x8x8xf32> to vector<8x8xf32>
    %cst_131 = arith.constant dense<0.000000e+00> : vector<64x8xf32>
    %135 = tpu.matmul %132, %134, %cst_131 {dimension_numbers = #tpu.dot_dimension_numbers<[1], [0], [0], [1], [0, 0, 1, 1], [], []>} : vector<64x8xf32>, vector<8x8xf32>, vector<64x8xf32> -> vector<64x8xf32>
    %136 = arith.addf %131, %135 : vector<64x8xf32>
    %137 = arith.addf %120, %136 : vector<64x8xf32>
    %cst_132 = arith.constant 0.000000e+00 : f32
    %138 = vector.broadcast %cst_132 : f32 to vector<64x8xf32>
    %c2_133 = arith.constant 2 : index
    %c0_134 = arith.constant 0 : index
    %139 = vector.load %arg8[%c2_133, %c0_134] : memref<82x8xf32, #tpu.memory_space<vmem>>, vector<64x8xf32>
    %c0_135 = arith.constant 0 : index
    %c2_136 = arith.constant 2 : index
    %c0_137 = arith.constant 0 : index
    %c0_138 = arith.constant 0 : index
    %140 = vector.load %arg4[%c0_135, %c2_136, %c0_137, %c0_138] : memref<3x3x8x8xf32, #tpu.memory_space<vmem>>, vector<1x1x8x8xf32>
    %141 = vector.shape_cast %140 : vector<1x1x8x8xf32> to vector<8x8xf32>
    %cst_139 = arith.constant dense<0.000000e+00> : vector<64x8xf32>
    %142 = tpu.matmul %139, %141, %cst_139 {dimension_numbers = #tpu.dot_dimension_numbers<[1], [0], [0], [1], [0, 0, 1, 1], [], []>} : vector<64x8xf32>, vector<8x8xf32>, vector<64x8xf32> -> vector<64x8xf32>
    %143 = arith.addf %138, %142 : vector<64x8xf32>
    %c10_140 = arith.constant 10 : index
    %c0_141 = arith.constant 0 : index
    %144 = vector.load %arg8[%c10_140, %c0_141] : memref<82x8xf32, #tpu.memory_space<vmem>>, vector<64x8xf32>
    %c1_142 = arith.constant 1 : index
    %c2_143 = arith.constant 2 : index
    %c0_144 = arith.constant 0 : index
    %c0_145 = arith.constant 0 : index
    %145 = vector.load %arg4[%c1_142, %c2_143, %c0_144, %c0_145] : memref<3x3x8x8xf32, #tpu.memory_space<vmem>>, vector<1x1x8x8xf32>
    %146 = vector.shape_cast %145 : vector<1x1x8x8xf32> to vector<8x8xf32>
    %cst_146 = arith.constant dense<0.000000e+00> : vector<64x8xf32>
    %147 = tpu.matmul %144, %146, %cst_146 {dimension_numbers = #tpu.dot_dimension_numbers<[1], [0], [0], [1], [0, 0, 1, 1], [], []>} : vector<64x8xf32>, vector<8x8xf32>, vector<64x8xf32> -> vector<64x8xf32>
    %148 = arith.addf %143, %147 : vector<64x8xf32>
    %c18_147 = arith.constant 18 : index
    %c0_148 = arith.constant 0 : index
    %149 = vector.load %arg8[%c18_147, %c0_148] : memref<82x8xf32, #tpu.memory_space<vmem>>, vector<64x8xf32>
    %c2_149 = arith.constant 2 : index
    %c2_150 = arith.constant 2 : index
    %c0_151 = arith.constant 0 : index
    %c0_152 = arith.constant 0 : index
    %150 = vector.load %arg4[%c2_149, %c2_150, %c0_151, %c0_152] : memref<3x3x8x8xf32, #tpu.memory_space<vmem>>, vector<1x1x8x8xf32>
    %151 = vector.shape_cast %150 : vector<1x1x8x8xf32> to vector<8x8xf32>
    %cst_153 = arith.constant dense<0.000000e+00> : vector<64x8xf32>
    %152 = tpu.matmul %149, %151, %cst_153 {dimension_numbers = #tpu.dot_dimension_numbers<[1], [0], [0], [1], [0, 0, 1, 1], [], []>} : vector<64x8xf32>, vector<8x8xf32>, vector<64x8xf32> -> vector<64x8xf32>
    %153 = arith.addf %148, %152 : vector<64x8xf32>
    %cst_154 = arith.constant 0.000000e+00 : f32
    %154 = vector.shape_cast %23 : vector<64x1xi1> to vector<64x1xi1>
    %155 = vector.broadcast %154 : vector<64x1xi1> to vector<64x8xi1>
    %156 = vector.broadcast %cst_154 : f32 to vector<64x8xf32>
    %157 = arith.select %155, %153, %156 : vector<64x8xi1>, vector<64x8xf32>
    %158 = arith.addf %137, %157 : vector<64x8xf32>
    %c0_155 = arith.constant 0 : index
    %c0_156 = arith.constant 0 : index
    %159 = vector.load %arg5[%c0_155, %c0_156] : memref<1x8xf32, #tpu.memory_space<vmem>>, vector<1x8xf32>
    %160 = vector.broadcast %159 : vector<1x8xf32> to vector<64x8xf32>
    %161 = arith.addf %158, %160 : vector<64x8xf32>
    %cst_157 = arith.constant 0.000000e+00 : f32
    %162 = vector.broadcast %cst_157 : f32 to vector<64x8xf32>
    %163 = arith.maximumf %161, %162 : vector<64x8xf32>
    %c0_158 = arith.constant 0 : index
    %c0_159 = arith.constant 0 : index
    %c0_160 = arith.constant 0 : index
    %164 = vector.load %arg6[%c0_158, %c0_159, %c0_160] : memref<1x64x8xf32, #tpu.memory_space<vmem>>, vector<1x64x8xf32>
    %165 = vector.shape_cast %164 : vector<1x64x8xf32> to vector<64x8xf32>
    %166 = vector.shape_cast %163 : vector<64x8xf32> to vector<1x64x8xf32>
    tpu.vector_store %arg6[%c0_158, %c0_159, %c0_160], %166 {strides = array<i32>} : memref<1x64x8xf32, #tpu.memory_space<vmem>>, vector<1x64x8xf32>,
    return
  }
  func.func @transform_0(%arg0: i32) -> (i32, i32, i32, i32) {
    %c0_i32 = arith.constant 0 : i32
    %c0_i32_0 = arith.constant 0 : i32
    %c0_i32_1 = arith.constant 0 : i32
    %c0_i32_2 = arith.constant 0 : i32
    return %arg0, %c0_i32, %c0_i32_0, %c0_i32_1 : i32, i32, i32, i32
  }
  func.func @transform_1(%arg0: i32) -> (i32, i32, i32, i32) {
    %c0_i32 = arith.constant 0 : i32
    %c0_i32_0 = arith.constant 0 : i32
    %c0_i32_1 = arith.constant 0 : i32
    %c0_i32_2 = arith.constant 0 : i32
    %c0_i32_3 = arith.constant 0 : i32
    return %c0_i32, %c0_i32_0, %c0_i32_1, %c0_i32_2 : i32, i32, i32, i32
  }
  func.func @transform_2(%arg0: i32) -> (i32, i32) {
    %c0_i32 = arith.constant 0 : i32
    %c0_i32_0 = arith.constant 0 : i32
    %c0_i32_1 = arith.constant 0 : i32
    return %c0_i32, %c0_i32_0 : i32, i32
  }
  func.func @transform_3(%arg0: i32) -> (i32, i32, i32, i32) {
    %c0_i32 = arith.constant 0 : i32
    %c0_i32_0 = arith.constant 0 : i32
    %c0_i32_1 = arith.constant 0 : i32
    %c0_i32_2 = arith.constant 0 : i32
    %c0_i32_3 = arith.constant 0 : i32
    return %c0_i32, %c0_i32_0, %c0_i32_1, %c0_i32_2 : i32, i32, i32, i32
  }
  func.func @transform_4(%arg0: i32) -> (i32, i32) {
    %c0_i32 = arith.constant 0 : i32
    %c0_i32_0 = arith.constant 0 : i32
    %c0_i32_1 = arith.constant 0 : i32
    return %c0_i32, %c0_i32_0 : i32, i32
  }
  func.func @transform_5(%arg0: i32) -> (i32, i32, i32) {
    %c0_i32 = arith.constant 0 : i32
    %c0_i32_0 = arith.constant 0 : i32
    %c0_i32_1 = arith.constant 0 : i32
    return %arg0, %c0_i32, %c0_i32_0 : i32, i32, i32
  }
}

</mosaic_0001>

<bundles_post_ra>
// kernel: down_forward.1
= control target key start
LH: loop header
LB: loop body
LE: loop exit
PB: predicated region body
PF: predicated region fallthrough
CT: control target
= control target key end

     0   :  { %s3833_s18 = smov 0   ;;  %s4354_s0 = inlined_call_operand.vmem [shape: f32[2,4,64,4], index: 0, kind: input, shape index: {}]   ;;  %s4355_s1 = inlined_call_operand.vmem [shape: f32[3,3,4,8], index: 1, kind: input, shape index: {}]   ;;  %s4356_s2 = inlined_call_operand.vmem [shape: f32[1,8], index: 2, kind: input, shape index: {}]   ;;  %s4357_s3 = inlined_call_operand.vmem [shape: f32[3,3,8,8], index: 3, kind: input, shape index: {}]   ;;  %s4358_s4 = inlined_call_operand.vmem [shape: f32[1,8], index: 4, kind: input, shape index: {}]   ;;  %s4359_s5 = inlined_call_operand.vmem [shape: f32[2,64,8], index: 5, kind: output, shape index: {}]  }
   0x1 LB: > { %s3091_s19 = sadd.s32 4294967295, %s3800_s18   ;;  %p3095_p0 = scmp.ge.s32.totalorder %s3800_s18, 1  ;;  %s3800_s18 = sphi %s3833_s18, %s15_s18  }
   0x2   : > { %p187_p1 = scmp.lt.s32.totalorder %s3800_s18, 3 }
   0x4   : > { %p188_p2 = pnand %p3095_p0, %p187_p1 }
   0x5   : > { %v3100_v0 = vld [vmem:[%s4355_s1 + $0xc] sm:$0xf] (!%p188_p2)  ;;  %vm484_vm0 = vcmask (!%p188_p2), 1043456   ;;  %p215_p3 = scmp.lt.s32.totalorder (!%p188_p2), %s3091_s19, 1  ;;  %vm257_vm1 = vcmask (!%p188_p2), 31744   ;;  %vm436_vm2 = vcmask (!%p188_p2), 24576  }
   0x6   : > { %191 = sbr.rel (%p188_p2) target bundleno = 656 (0x290), region = 40  ;;  %3437 = vmatprep.subr.msk.mxu0 (!%p188_p2), %vm484_vm0, %v3100_v0  ;;  %v3802_v1 = vmov (!%p188_p2), 0.0   ;;  %v3852_v2 = vld [vmem:[%s4355_s1] sm:$0xf] (!%p188_p2)  ;;  %v3130_v3 = vld [vmem:[%s4355_s1 + $0x10] sm:$0xf] (!%p188_p2) }
   0x7   : > { %435 = vst.msk [vmem:[#allocation2] sm:$0xff] (!%p188_p2), %vm257_vm1, %v3802_v1  ;;  %438 = vst.msk [vmem:[#allocation2 + $0x49] sm:$0xff] (!%p188_p2), %vm257_vm1, %v3802_v1  ;;  %3438 = vmatpush3.msk.msra.mxu0 (!%p188_p2), %vm484_vm0, %v3100_v0  ;;  %3479 = vmatprep.subr.msk.mxu1 (!%p188_p2), %vm484_vm0, %v3130_v3  ;;  %v3866_v4 = vld [vmem:[%s4355_s1 + $0x4] sm:$0xf] (!%p188_p2)  ;;  %vm1761_vm3 = vcmask (!%p188_p2), 64512   ;;  %vm1763_vm4 = vcmask (!%p188_p2), 57344  }
   0x8   : > { %437 = vst.msk [vmem:[#allocation2 + $0x8] sm:$0x1] (!%p188_p2), %vm436_vm2, %v3802_v1  ;;  %439 = vst.msk [vmem:[#allocation2 + $0x51] sm:$0x1] (!%p188_p2), %vm436_vm2, %v3802_v1  ;;  %3451 = vmatprep.subr.msk.mxu0 (!%p188_p2), %vm484_vm0, %v3852_v2  ;;  %3480 = vmatpush3.msk.msra.mxu1 (!%p188_p2), %vm484_vm0, %v3130_v3 }
   0x9   : > { %3493 = vmatprep.subr.msk.mxu1 (!%p188_p2), %vm484_vm0, %v3866_v4  ;;  %1762 = vst.msk [vmem:[#allocation3] sm:$0xff] (!%p188_p2), %vm1761_vm3, %v3802_v1  ;;  %1765 = vst.msk [vmem:[#allocation3 + $0x49] sm:$0xff] (!%p188_p2), %vm1761_vm3, %v3802_v1 }
   0xa   : > { %1764 = vst.msk [vmem:[#allocation3 + $0x8] sm:$0x1] (!%p188_p2), %vm1763_vm4, %v3802_v1  ;;  %1766 = vst.msk [vmem:[#allocation3 + $0x51] sm:$0x1] (!%p188_p2), %vm1763_vm4, %v3802_v1  ;;  %v314_v1 = vlaneseq (!%p188_p2) }
   0xd   : > { %s4395_s19 = smov (!%p215_p3, %s3091_s19), 1 }
   0xe   : > { %s3273_s28 = sshll.u32 %s4395_s19, 8  ;;  %s3274_s16 = sshll.u32 %s4395_s19, 6 }
   0xf   : > { %s3877_s6 = scalar_lea.vmem %s4354_s0, %s3273_s28  ;;  %s4321_s21 = scalar_lea.vmem %s4359_s5, %s3274_s16 }
  0x10   : > { %v225_v5 = vld [vmem:[%s3877_s6] sm:$0xff]  ;;  %v226_v12 = vld [vmem:[%s3877_s6 + $0x8] sm:$0xff]  ;;  %v227_v20 = vld [vmem:[%s3877_s6 + $0x10] sm:$0xff] }
  0x11   : > { %v233_v6 = vld [vmem:[%s3877_s6 + $0x40] sm:$0xff]  ;;  %v258_v9 = vsel %vm257_vm1, %v225_v5, -inf  ;;  %v234_v13 = vld [vmem:[%s3877_s6 + $0x48] sm:$0xff]  ;;  %v265_v18 = vsel %vm257_vm1, %v226_v12, -inf  ;;  %v235_v24 = vld [vmem:[%s3877_s6 + $0x50] sm:$0xff]  ;;  %v272_v27 = vsel %vm257_vm1, %v227_v20, -inf }
  0x12   : > { %v241_v7 = vld [vmem:[%s3877_s6 + $0x80] sm:$0xff]  ;;  %v259_v10 = vsel %vm257_vm1, %v233_v6, -inf  ;;  %v242_v16 = vld [vmem:[%s3877_s6 + $0x88] sm:$0xff]  ;;  %v266_v19 = vsel %vm257_vm1, %v234_v13, -inf  ;;  %v243_v25 = vld [vmem:[%s3877_s6 + $0x90] sm:$0xff]  ;;  %v273_v29 = vsel %vm257_vm1, %v235_v24, -inf }
  0x13   : > { %v249_v8 = vld [vmem:[%s3877_s6 + $0xc0] sm:$0xff]  ;;  %v261_v11 = vsel %vm257_vm1, %v241_v7, -inf  ;;  %v260_v14 = vmax.f32 %v258_v9, %v259_v10  ;;  %v250_v17 = vld [vmem:[%s3877_s6 + $0xc8] sm:$0xff]  ;;  %v267_v21 = vmax.f32 %v265_v18, %v266_v19  ;;  %v268_v22 = vsel %vm257_vm1, %v242_v16, -inf  ;;  %v251_v26 = vld [vmem:[%s3877_s6 + $0xd0] sm:$0xff] }
  0x14   : > { %v263_v15 = vsel %vm257_vm1, %v249_v8, -inf  ;;  %v270_v23 = vsel %vm257_vm1, %v250_v17, -inf  ;;  %v275_v30 = vsel %vm257_vm1, %v243_v25, -inf  ;;  %v277_v31 = vsel %vm257_vm1, %v251_v26, -inf  ;;  %v228_v32 = vld [vmem:[%s3877_s6 + $0x18] sm:$0xff]  ;;  %v229_v40 = vld [vmem:[%s3877_s6 + $0x20] sm:$0xff] }
  0x15   : > { %v262_v28 = vmax.f32 %v260_v14, %v261_v11  ;;  %v236_v33 = vld [vmem:[%s3877_s6 + $0x58] sm:$0xff]  ;;  %v269_v35 = vmax.f32 %v267_v21, %v268_v22  ;;  %v274_v36 = vmax.f32 %v272_v27, %v273_v29  ;;  %v279_v38 = vsel %vm257_vm1, %v228_v32, -inf  ;;  %v237_v41 = vld [vmem:[%s3877_s6 + $0x60] sm:$0xff]  ;;  %v230_v48 = vld [vmem:[%s3877_s6 + $0x28] sm:$0xff] }
  0x16   : > { %v244_v34 = vld [vmem:[%s3877_s6 + $0x98] sm:$0xff]  ;;  %v280_v39 = vsel %vm257_vm1, %v236_v33, -inf  ;;  %v245_v46 = vld [vmem:[%s3877_s6 + $0xa0] sm:$0xff]  ;;  %v286_v51 = vsel %vm257_vm1, %v229_v40, -inf  ;;  %v287_v52 = vsel %vm257_vm1, %v237_v41, -inf  ;;  %v238_v53 = vld [vmem:[%s3877_s6 + $0x68] sm:$0xff] }
  0x17   : > { %v252_v37 = vld [vmem:[%s3877_s6 + $0xd8] sm:$0xff]  ;;  %v264_v42 = vmax.f32 %v262_v28, %v263_v15  ;;  %v281_v43 = vmax.f32 %v279_v38, %v280_v39  ;;  %v282_v44 = vsel %vm257_vm1, %v244_v34, -inf  ;;  %v253_v47 = vld [vmem:[%s3877_s6 + $0xe0] sm:$0xff]  ;;  %v271_v49 = vmax.f32 %v269_v35, %v270_v23  ;;  %v246_v54 = vld [vmem:[%s3877_s6 + $0xa8] sm:$0xff] }
  0x18   : > { %v284_v45 = vsel %vm257_vm1, %v252_v37, -inf  ;;  %v276_v50 = vmax.f32 %v274_v36, %v275_v30  ;;  %v254_v55 = vld [vmem:[%s3877_s6 + $0xe8] sm:$0xff]  ;;  %v288_v57 = vmax.f32 %v286_v51, %v287_v52  ;;  %v289_v58 = vsel %vm257_vm1, %v245_v46, -inf  ;;  %v231_v60 = vld [vmem:[%s3877_s6 + $0x30] sm:$0xff]  ;;  %v232_v6 = vld [vmem:[%s3877_s6 + $0x38] sm:$0xff] }
  0x19   : > { %440 = vst.msk [vmem:[#allocation2 + $0x9] sm:$0xff] %vm257_vm1, %v264_v42  ;;  %v283_v56 = vmax.f32 %v281_v43, %v282_v44  ;;  %v291_v59 = vsel %vm257_vm1, %v253_v47, -inf  ;;  %v239_v61 = vld [vmem:[%s3877_s6 + $0x70] sm:$0xff]  ;;  %441 = vst.msk [vmem:[#allocation2 + $0x11] sm:$0xff] %vm257_vm1, %v271_v49  ;;  %v293_v0 = vsel %vm257_vm1, %v230_v48, -inf  ;;  %v294_v3 = vsel %vm257_vm1, %v238_v53, -inf }
  0x1a   : > { %v247_v62 = vld [vmem:[%s3877_s6 + $0xb0] sm:$0xff]  ;;  %v278_v63 = vmax.f32 %v276_v50, %v277_v31  ;;  %v296_v5 = vsel %vm257_vm1, %v246_v54, -inf  ;;  %v290_v8 = vmax.f32 %v288_v57, %v289_v58  ;;  %v295_v9 = vmax.f32 %v293_v0, %v294_v3  ;;  %v240_v11 = vld [vmem:[%s3877_s6 + $0x78] sm:$0xff]  ;;  %v448_v46 = vld [vmem:[#allocation2] sm:$0xff] }
  0x1b   : > { %v285_v7 = vmax.f32 %v283_v56, %v284_v45  ;;  %v255_v10 = vld [vmem:[%s3877_s6 + $0xf0] sm:$0xff]  ;;  %v248_v12 = vld [vmem:[%s3877_s6 + $0xb8] sm:$0xff]  ;;  %v298_v13 = vsel %vm257_vm1, %v254_v55, -inf  ;;  %v300_v14 = vsel %vm257_vm1, %v231_v60, -inf  ;;  %v301_v15 = vsel %vm257_vm1, %v239_v61, -inf  ;;  %v886_v49 = vld [vmem:[#allocation2 + $0x1] sm:$0xff] }
  0x1c   : > { %442 = vst.msk [vmem:[#allocation2 + $0x19] sm:$0xff] %vm257_vm1, %v278_v63  ;;  %v303_v16 = vsel %vm257_vm1, %v247_v62, -inf  ;;  %v292_v17 = vmax.f32 %v290_v8, %v291_v59  ;;  %v297_v18 = vmax.f32 %v295_v9, %v296_v5  ;;  %v302_v19 = vmax.f32 %v300_v14, %v301_v15  ;;  %v256_v20 = vld [vmem:[%s3877_s6 + $0xf8] sm:$0xff]  ;;  %v3160_v50 = vld [vmem:[%s4355_s1 + $0x14] sm:$0xf]  ;;  %v1149_v53 = vld [vmem:[#allocation2 + $0x49] sm:$0xff] }
  0x1d   : > { %443 = vst.msk [vmem:[#allocation2 + $0x21] sm:$0xff] %vm257_vm1, %v285_v7  ;;  %v307_v21 = vsel %vm257_vm1, %v232_v6, -inf  ;;  %v305_v22 = vsel %vm257_vm1, %v255_v10, -inf  ;;  %v308_v23 = vsel %vm257_vm1, %v240_v11, -inf  ;;  %v310_v24 = vsel %vm257_vm1, %v248_v12, -inf  ;;  %v1563_v0 = vld [vmem:[#allocation2 + $0x4a] sm:$0xff] }
  0x1e   : > { %444 = vst.msk [vmem:[#allocation2 + $0x29] sm:$0xff] %vm257_vm1, %v292_v17  ;;  %v299_v25 = vmax.f32 %v297_v18, %v298_v13  ;;  %v304_v26 = vmax.f32 %v302_v19, %v303_v16  ;;  %v309_v27 = vmax.f32 %v307_v21, %v308_v23  ;;  %v312_v30 = vsel %vm257_vm1, %v256_v20, -inf  ;;  %v3119_v35 = vld [vmem:[%s4355_s1 + $0x18] sm:$0xf]  ;;  %v3149_v36 = vld [vmem:[%s4355_s1 + $0x1c] sm:$0xf] }
  0x1f   : > { %v3159_v51 = vld [vmem:[%s4355_s1 + $0x8] sm:$0xf]  ;;  %v3179_v57 = vld [vmem:[%s4355_s1 + $0x20] sm:$0xf]  ;;  %v3190_v3 = vld [vmem:[%s4357_s3 + $0x18] sm:$0xff]  ;;  %v315_v8 = vshrl.u32 %v314_v1, 7 }
  0x20   : > { %v449_v28 = vld [vmem:[#allocation2 + $0x8] sm:$0xff]  ;;  %v3949_v31 = vld [vmem:[#allocation2 + $0x10] sm:$0xff]  ;;  %445 = vst.msk [vmem:[#allocation2 + $0x31] sm:$0xff] %vm257_vm1, %v299_v25  ;;  %v306_v33 = vmax.f32 %v304_v26, %v305_v22  ;;  %v311_v34 = vmax.f32 %v309_v27, %v310_v24  ;;  %v3217_v5 = vld [vmem:[%s4357_s3 + $0x20] sm:$0xff] }
  0x21   : > { %v887_v29 = vld [vmem:[#allocation2 + $0x9] sm:$0xff]  ;;  %3439 = vmatprep.mubr.msk.f32.mxu0 %vm257_vm1, %v449_v28  ;;  %v888_v32 = vld [vmem:[#allocation2 + $0x11] sm:$0xff]  ;;  %v4072_v6 = vld [vmem:[%s4357_s3] sm:$0xff]  ;;  %v316_v9 = vadd.s32 8, %v315_v8  ;;  %v318_v10 = vadd.s32 24, %v315_v8  ;;  %v327_v12 = vand.u32 7, %v315_v8 }
  0x22   : > { %3481 = vmatprep.mubr.msk.f32.mxu1 %vm257_vm1, %v887_v29  ;;  %3440 = vmatmul.mubr.msk.f32.vlgmr.msra.gmra.mrb[0].mxu0 %vm257_vm1, %v3949_v31  ;;  %446 = vst.msk [vmem:[#allocation2 + $0x39] sm:$0xff] %vm257_vm1, %v306_v33  ;;  %v313_v39 = vmax.f32 %v311_v34, %v312_v30  ;;  %v1301_v54 = vld [vmem:[#allocation2 + $0xa] sm:$0xff]  ;;  %v1300_v63 = vld [vmem:[#allocation2 + $0x2] sm:$0xff]  ;;  %v317_v13 = vadd.s32 16, %v315_v8  ;;  %v4085_v16 = vadd.s32 40, %v315_v8  ;;  %v4091_v19 = vadd.s32 32, %v315_v8 }
  0x23   : > { %3482 = vmatmul.mubr.msk.f32.vlgmr.msra.gmra.mrb[0].mxu1 %vm257_vm1, %v888_v32  ;;  %3452 = vmatpush3.msk.msra.mxu0 %vm484_vm0, %v3852_v2  ;;  %v451_v37 = vld [vmem:[#allocation2 + $0x18] sm:$0xff]  ;;  %v4078_v7 = vld [vmem:[%s4357_s3 + $0x8] sm:$0xff]  ;;  %v334_v11 = vand.u32 7, %v316_v9  ;;  %v348_v14 = vand.u32 7, %v318_v10  ;;  %vm4087_vm6 = vcmp.ge.s32.totalorder %v327_v12, 1  ;;  %v4109_v33 = vadd.s32 48, %v315_v8 }
  0x24   : > { %v889_v38 = vld [vmem:[#allocation2 + $0x19] sm:$0xff]  ;;  %3494 = vmatpush3.msk.msra.mxu1 %vm484_vm0, %v3866_v4  ;;  %3442 = vmatprep.mubr.msk.f32.mxu0 %vm257_vm1, %v451_v37  ;;  %v890_v41 = vld [vmem:[#allocation2 + $0x21] sm:$0xff]  ;;  %447 = vst.msk [vmem:[#allocation2 + $0x41] sm:$0xff] %vm257_vm1, %v313_v39  ;;  %v341_v18 = vand.u32 7, %v317_v13  ;;  %vm4145_vm14 = vcmp.lt.s32.totalorder %v327_v12, 7  ;;  %v4383_v12 = vmov 0 }
  0x25   : > { %v452_v40 = vld [vmem:[#allocation2 + $0x20] sm:$0xff]  ;;  %3484 = vmatprep.mubr.msk.f32.mxu1 %vm257_vm1, %v889_v38  ;;  %3465 = vmatprep.subr.msk.mxu0 %vm484_vm0, %v3119_v35  ;;  %v453_v2 = vld [vmem:[#allocation2 + $0x28] sm:$0xff]  ;;  %v1302_v55 = vld [vmem:[#allocation2 + $0x12] sm:$0xff]  ;;  %vm4081_vm5 = vcmp.ge.s32.totalorder %v334_v11, 1  ;;  %vm4095_vm7 = vcmp.ge.s32.totalorder %v348_v14, 1  ;;  %vm4141_vm13 = vcmp.lt.s32.totalorder %v334_v11, 7 }
  0x26   : > { %3507 = vmatprep.subr.msk.mxu1 %vm484_vm0, %v3149_v36  ;;  %3443 = vmatmul.mubr.msk.f32.gmra.mrb[2].mxu0 %vm257_vm1, %v452_v40  ;;  %v891_v42 = vld [vmem:[#allocation2 + $0x29] sm:$0xff]  ;;  %v1303_v56 = vld [vmem:[#allocation2 + $0x1a] sm:$0xff]  ;;  %vm4104_vm8 = vcmp.ge.s32.totalorder %v341_v18, 1  ;;  %vm4156_vm15 = vcmp.lt.s32.totalorder %v348_v14, 7 }
  0x27   : > { %3485 = vmatmul.mubr.msk.f32.gmra.mrb[2].mxu1 %vm257_vm1, %v890_v41  ;;  %3445 = vmatprep.mubr.msk.f32.mxu0 %vm257_vm1, %v453_v2  ;;  %v454_v4 = vld [vmem:[#allocation2 + $0x30] sm:$0xff]  ;;  %v1304_v58 = vld [vmem:[#allocation2 + $0x22] sm:$0xff] }
  0x28   : > { %3487 = vmatprep.mubr.msk.f32.mxu1 %vm257_vm1, %v891_v42  ;;  %v892_v43 = vld [vmem:[#allocation2 + $0x31] sm:$0xff] }
  0x29   : > { %v455_v44 = vld [vmem:[#allocation2 + $0x38] sm:$0xff]  ;;  %v1305_v59 = vld [vmem:[#allocation2 + $0x2a] sm:$0xff] }
  0x2a   : > { %3446 = vmatmul.mubr.msk.f32.gmra.mrb[4].mxu0 %vm257_vm1, %v454_v4  ;;  %v893_v45 = vld [vmem:[#allocation2 + $0x39] sm:$0xff] }
  0x2b   : > { %3488 = vmatmul.mubr.msk.f32.gmra.mrb[4].mxu1 %vm257_vm1, %v892_v43  ;;  %3448 = vmatprep.mubr.msk.f32.mxu0 %vm257_vm1, %v455_v44  ;;  %v457_v47 = vld [vmem:[#allocation2 + $0x40] sm:$0xff]  ;;  %v711_v52 = vld [vmem:[#allocation2 + $0x48] sm:$0xff]  ;;  %v1306_v60 = vld [vmem:[#allocation2 + $0x32] sm:$0xff] }
  0x2c   : > { %3490 = vmatprep.mubr.msk.f32.mxu1 %vm257_vm1, %v893_v45  ;;  %v896_v48 = vld [vmem:[#allocation2 + $0x41] sm:$0xff] }
  0x2d   : > { %v1307_v61 = vld [vmem:[#allocation2 + $0x3a] sm:$0xff]  ;;  %v1310_v62 = vld [vmem:[#allocation2 + $0x42] sm:$0xff] }
  0x2e   : > { %3449 = vmatmul.mubr.msk.f32.gmra.mrb[6].mxu0 %vm257_vm1, %v457_v47 }
  0x2f   : > { %3491 = vmatmul.mubr.msk.f32.gmra.mrb[6].mxu1 %vm257_vm1, %v896_v48  ;;  %3453 = vmatprep.mubr.msk.f32.mxu0 %vm257_vm1, %v448_v46 }
  0x30   : > { %3495 = vmatprep.mubr.msk.f32.mxu1 %vm257_vm1, %v886_v49 }
  0x32   : > { %3454 = vmatmul.mubr.msk.f32.vlgmr.msra.gmra.mrb[0].mxu0 %vm257_vm1, %v449_v28  ;;  %v362_v28 = vand.u32 7, %v4085_v16 }
  0x33   : > { %3496 = vmatmul.mubr.msk.f32.vlgmr.msra.gmra.mrb[0].mxu1 %vm257_vm1, %v887_v29  ;;  %3466 = vmatpush3.msk.msra.mxu0 %vm484_vm0, %v3119_v35  ;;  %v4102_v29 = vadd.s32 56, %v315_v8 }
  0x34   : > { %3456 = vmatprep.mubr.msk.f32.mxu0 %vm257_vm1, %v3949_v31  ;;  %3498 = vmatprep.mubr.msk.f32.mxu1 %vm257_vm1, %v888_v32  ;;  %vm4115_vm9 = vcmp.ge.s32.totalorder %v362_v28, 1 }
  0x35   : > { %3521 = vmatprep.subr.msk.mxu0 %vm484_vm0, %v3160_v50  ;;  %3508 = vmatpush3.msk.msra.mxu1 %vm484_vm0, %v3149_v36 }
  0x36   : > { %3457 = vmatmul.mubr.msk.f32.gmra.mrb[2].mxu0 %vm257_vm1, %v451_v37  ;;  %3563 = vmatprep.subr.mxu1 %v3190_v3 }
  0x37   : > { %3499 = vmatmul.mubr.msk.f32.gmra.mrb[2].mxu1 %vm257_vm1, %v889_v38  ;;  %3459 = vmatprep.mubr.msk.f32.mxu0 %vm257_vm1, %v452_v40 }
  0x38   : > { %3501 = vmatprep.mubr.msk.f32.mxu1 %vm257_vm1, %v890_v41 }
  0x3a   : > { %3460 = vmatmul.mubr.msk.f32.gmra.mrb[4].mxu0 %vm257_vm1, %v453_v2 }
  0x3b   : > { %3502 = vmatmul.mubr.msk.f32.gmra.mrb[4].mxu1 %vm257_vm1, %v891_v42  ;;  %3462 = vmatprep.mubr.msk.f32.mxu0 %vm257_vm1, %v454_v4 }
  0x3c   : > { %3504 = vmatprep.mubr.msk.f32.mxu1 %vm257_vm1, %v892_v43 }
  0x3e   : > { %3463 = vmatmul.mubr.msk.f32.gmra.mrb[6].mxu0 %vm257_vm1, %v455_v44 }
  0x3f   : > { %3505 = vmatmul.mubr.msk.f32.gmra.mrb[6].mxu1 %vm257_vm1, %v893_v45  ;;  %3467 = vmatprep.mubr.msk.f32.mxu0 %vm257_vm1, %v3949_v31 }
  0x40   : > { %3509 = vmatprep.mubr.msk.f32.mxu1 %vm257_vm1, %v888_v32  ;;  %v355_v32 = vand.u32 7, %v4091_v19 }
  0x42   : > { %3468 = vmatmul.mubr.msk.f32.vlgmr.msra.gmra.mrb[0].mxu0 %vm257_vm1, %v451_v37  ;;  %vm4120_vm10 = vcmp.ge.s32.totalorder %v355_v32, 1  ;;  %vm4172_vm2 = vcmp.lt.s32.totalorder %v355_v32, 7 }
  0x43   : > { %3510 = vmatmul.mubr.msk.f32.vlgmr.msra.gmra.mrb[0].mxu1 %vm257_vm1, %v889_v38  ;;  %3522 = vmatpush3.msk.msra.mxu0 %vm484_vm0, %v3160_v50 }
  0x44   : > { %3470 = vmatprep.mubr.msk.f32.mxu0 %vm257_vm1, %v452_v40  ;;  %3512 = vmatprep.mubr.msk.f32.mxu1 %vm257_vm1, %v890_v41 }
  0x45   : > { %3535 = vmatprep.subr.msk.mxu0 %vm484_vm0, %v3159_v51  ;;  %3564 = vmatpush3.msra.mxu1 %v3190_v3 }
  0x46   : > { %3471 = vmatmul.mubr.msk.f32.gmra.mrb[2].mxu0 %vm257_vm1, %v453_v2  ;;  %3577 = vmatprep.subr.mxu1 %v4072_v6  ;;  %v376_v2 = vand.u32 7, %v4102_v29 }
  0x47   : > { %3513 = vmatmul.mubr.msk.f32.gmra.mrb[2].mxu1 %vm257_vm1, %v891_v42  ;;  %3473 = vmatprep.mubr.msk.f32.mxu0 %vm257_vm1, %v454_v4  ;;  %v3270_v4 = vld [vmem:[%s4358_s4] ss:$0 sm:$0xff] }
  0x48   : > { %3515 = vmatprep.mubr.msk.f32.mxu1 %vm257_vm1, %v892_v43  ;;  %v369_v43 = vand.u32 7, %v4109_v33  ;;  %vm4129_vm11 = vcmp.ge.s32.totalorder %v376_v2, 1  ;;  %vm4182_vm4 = vcmp.lt.s32.totalorder %v376_v2, 7 }
  0x4a   : > { %3474 = vmatmul.mubr.msk.f32.gmra.mrb[4].mxu0 %vm257_vm1, %v455_v44  ;;  %vm4133_vm12 = vcmp.ge.s32.totalorder %v369_v43, 1 }
  0x4b   : > { %3516 = vmatmul.mubr.msk.f32.gmra.mrb[4].mxu1 %vm257_vm1, %v893_v45  ;;  %3476 = vmatprep.mubr.msk.f32.mxu0 %vm257_vm1, %v457_v47 }
  0x4c   : > { %3518 = vmatprep.mubr.msk.f32.mxu1 %vm257_vm1, %v896_v48 }
  0x4e   : > { %3477 = vmatmul.mubr.msk.f32.gmra.mrb[6].mxu0 %vm257_vm1, %v711_v52 }
  0x4f   : > { %3519 = vmatmul.mubr.msk.f32.gmra.mrb[6].mxu1 %vm257_vm1, %v1149_v53  ;;  %3523 = vmatprep.mubr.msk.f32.mxu0 %vm257_vm1, %v1301_v54 }
  0x52   : > { %3524 = vmatmul.mubr.msk.f32.vlgmr.msra.gmra.mrb[8].mxu0 %vm257_vm1, %v1302_v55 }
  0x53   : > { %3536 = vmatpush3.msk.msra.mxu0 %vm484_vm0, %v3159_v51  ;;  %3526 = vmatprep.mubr.msk.f32.mxu0 %vm257_vm1, %v1303_v56 }
  0x54   : > { %3549 = vmatprep.subr.msk.mxu0 %vm484_vm0, %v3179_v57 }
  0x56   : > { %3527 = vmatmul.mubr.msk.f32.gmra.mrb[10].mxu0 %vm257_vm1, %v1304_v58 }
  0x57   : > { %3529 = vmatprep.mubr.msk.f32.mxu0 %vm257_vm1, %v1305_v59 }
  0x5a   : > { %3530 = vmatmul.mubr.msk.f32.gmra.mrb[12].mxu0 %vm257_vm1, %v1306_v60 }
  0x5b   : > { %3532 = vmatprep.mubr.msk.f32.mxu0 %vm257_vm1, %v1307_v61 }
  0x5e   : > { %3533 = vmatmul.mubr.msk.f32.gmra.mrb[14].mxu0 %vm257_vm1, %v1310_v62 }
  0x5f   : > { %3537 = vmatprep.mubr.msk.f32.mxu0 %vm257_vm1, %v1300_v63 }
  0x62   : > { %3538 = vmatmul.mubr.msk.f32.vlgmr.msra.gmra.mrb[8].mxu0 %vm257_vm1, %v1301_v54 }
  0x63   : > { %3550 = vmatpush3.msk.msra.mxu0 %vm484_vm0, %v3179_v57  ;;  %3540 = vmatprep.mubr.msk.f32.mxu0 %vm257_vm1, %v1302_v55  ;;  %vm4160_vm0 = vcmp.lt.s32.totalorder %v341_v18, 7 }
  0x64   : > { %3605 = vmatprep.subr.mxu0 %v3217_v5  ;;  %v4384_v12 = vsel %vm4160_vm0, 4294967295, %v4383_v12 }
  0x66   : > { %3541 = vmatmul.mubr.msk.f32.gmra.mrb[10].mxu0 %vm257_vm1, %v1303_v56 }
  0x67   : > { %3543 = vmatprep.mubr.msk.f32.mxu0 %vm257_vm1, %v1304_v58 }
  0x6a   : > { %3544 = vmatmul.mubr.msk.f32.gmra.mrb[12].mxu0 %vm257_vm1, %v1305_v59 }
  0x6b   : > { %3546 = vmatprep.mubr.msk.f32.mxu0 %vm257_vm1, %v1306_v60 }
  0x6e   : > { %3547 = vmatmul.mubr.msk.f32.gmra.mrb[14].mxu0 %vm257_vm1, %v1307_v61 }
  0x6f   : > { %3551 = vmatprep.mubr.msk.f32.mxu0 %vm257_vm1, %v1302_v55 }
  0x72   : > { %3552 = vmatmul.mubr.msk.f32.vlgmr.msra.gmra.mrb[8].mxu0 %vm257_vm1, %v1303_v56 }
  0x73   : > { %3554 = vmatprep.mubr.msk.f32.mxu0 %vm257_vm1, %v1304_v58  ;;  %3606 = vmatpush3.msra.mxu0 %v3217_v5  ;;  %v3189_v5 = vld [vmem:[%s4356_s2] ss:$0 sm:$0xff] }
  0x74   : > { %3619 = vmatprep.subr.mxu0 %v4078_v7 }
  0x76   : > { %3555 = vmatmul.mubr.msk.f32.gmra.mrb[10].mxu0 %vm257_vm1, %v1305_v59 }
  0x77   : > { %3557 = vmatprep.mubr.msk.f32.mxu0 %vm257_vm1, %v1306_v60 }
  0x7a   : > { %3558 = vmatmul.mubr.msk.f32.gmra.mrb[12].mxu0 %vm257_vm1, %v1307_v61 }
  0x7b   : > { %3560 = vmatprep.mubr.msk.f32.mxu0 %vm257_vm1, %v1310_v62 }
  0x7e   : > { %3561 = vmatmul.mubr.msk.f32.gmra.mrb[14].mxu0 %vm257_vm1, %v1563_v0  ;;  %vm4168_vm1 = vcmp.lt.s32.totalorder %v362_v28, 7 }
 0x115   : > { %v3469_v20 = vpop.f32.mrb[0].mxu0 }
 0x116   : > { %v3511_v21 = vpop.f32.mrb[0].mxu1  ;;  %v871_v22 = vsel %vm4081_vm5, %v3469_v20, 0.0  ;;  %v807_v23 = vpop.f32.mrb[1].mxu0 }
 0x117   : > { %v1245_v24 = vpop.f32.mrb[1].mxu1  ;;  %v870_v26 = vsel %vm4087_vm6, %v807_v23, 0.0  ;;  %v1293_v27 = vadd.f32 %v3511_v21, %v871_v22 }
 0x118   : > { %v1292_v30 = vadd.f32 %v1245_v24, %v870_v26 }
 0x119   : > { %v3472_v34 = vpop.f32.mrb[2].mxu0 }
 0x11a   : > { %v3514_v35 = vpop.f32.mrb[2].mxu1  ;;  %v873_v36 = vsel %vm4095_vm7, %v3472_v34, 0.0  ;;  %v817_v37 = vpop.f32.mrb[3].mxu0 }
 0x11b   : > { %v1255_v38 = vpop.f32.mrb[3].mxu1  ;;  %v872_v39 = vsel %vm4104_vm8, %v817_v37, 0.0  ;;  %v1295_v40 = vadd.f32 %v3514_v35, %v873_v36 }
 0x11c   : > { %v1294_v42 = vadd.f32 %v1255_v38, %v872_v39 }
 0x11d   : > { %v3475_v44 = vpop.f32.mrb[4].mxu0 }
 0x11e   : > { %v3517_v45 = vpop.f32.mrb[4].mxu1  ;;  %v875_v46 = vsel %vm4115_vm9, %v3475_v44, 0.0  ;;  %v827_v47 = vpop.f32.mrb[5].mxu0 }
 0x11f   : > { %v1265_v48 = vpop.f32.mrb[5].mxu1  ;;  %v874_v49 = vsel %vm4120_vm10, %v827_v47, 0.0  ;;  %v1297_v50 = vadd.f32 %v3517_v45, %v875_v46 }
 0x120   : > { %v1296_v52 = vadd.f32 %v1265_v48, %v874_v49 }
 0x121   : > { %v3478_v54 = vpop.f32.mrb[6].mxu0 }
 0x122   : > { %v3520_v55 = vpop.f32.mrb[6].mxu1  ;;  %v877_v56 = vsel %vm4129_vm11, %v3478_v54, 0.0  ;;  %v837_v57 = vpop.f32.mrb[7].mxu0 }
 0x123   : > { %v1275_v58 = vpop.f32.mrb[7].mxu1  ;;  %v876_v59 = vsel %vm4133_vm12, %v837_v57, 0.0  ;;  %v1299_v60 = vadd.f32 %v3520_v55, %v877_v56 }
 0x124   : > { %v1298_v61 = vadd.f32 %v1275_v58, %v876_v59  ;;  %v3207_v59 = vld [vmem:[%s4357_s3 + $0x30] sm:$0xff] }
 0x145   : > { %v3553_v0 = vpop.f32.mrb[8].mxu0 }
 0x146   : > { %v1723_v3 = vsel %vm4141_vm13, %v3553_v0, 0.0  ;;  %v1659_v1 = vpop.f32.mrb[9].mxu0 }
 0x147   : > { %v1731_v8 = vadd.f32 %v1723_v3, %v1293_v27  ;;  %v1722_v9 = vsel %vm4145_vm14, %v1659_v1, 0.0 }
 0x148   : > { %v1730_v11 = vadd.f32 %v1722_v9, %v1292_v30 }
 0x149   : > { %v1746_v13 = vadd.f32 %v3189_v5, %v1731_v8  ;;  %v3556_v16 = vpop.f32.mrb[10].mxu0 }
 0x14a   : > { %v1745_v19 = vadd.f32 %v3189_v5, %v1730_v11  ;;  %v1725_v20 = vsel %vm4156_vm15, %v3556_v16, 0.0  ;;  %v1669_v21 = vpop.f32.mrb[11].mxu0  ;;  %v2187_v16 = vld [vmem:[#allocation3 + $0x1] sm:$0xff] }
 0x14b   : > { %v1754_v22 = vmax.f32 %v1746_v13, 0.0  ;;  %v1733_v23 = vadd.f32 %v1725_v20, %v1295_v40  ;;  %v1724_v14 = vsel %vm4160_vm0, %v1669_v21, 0.0  ;;  %vm4186_vm0 = vcmp.lt.s32.totalorder %v369_v43, 7  ;;  %v1775_v13 = vld [vmem:[#allocation3] sm:$0xff] }
 0x14c   : > { %v1753_v18 = vmax.f32 %v1745_v19, 0.0  ;;  %v1732_v26 = vadd.f32 %v1724_v14, %v1294_v42  ;;  %v3243_v14 = vld [vmem:[%s4357_s3 + $0x10] sm:$0xff] }
 0x14d   : > { %1768 = vst.msk [vmem:[#allocation3 + $0x11] sm:$0xff] %vm1761_vm3, %v1754_v22  ;;  %v1748_v29 = vadd.f32 %v3189_v5, %v1733_v23  ;;  %v3559_v30 = vpop.f32.mrb[12].mxu0  ;;  %v3244_v23 = vld [vmem:[%s4357_s3 + $0x28] sm:$0xff] }
 0x14e   : > { %1767 = vst.msk [vmem:[#allocation3 + $0x9] sm:$0xff] %vm1761_vm3, %v1753_v18  ;;  %v1747_v33 = vadd.f32 %v3189_v5, %v1732_v26  ;;  %v1727_v34 = vsel %vm4168_vm1, %v3559_v30, 0.0  ;;  %v1679_v28 = vpop.f32.mrb[13].mxu0  ;;  %v2444_v18 = vld [vmem:[#allocation3 + $0x49] sm:$0xff] }
 0x14f   : > { %v1756_v35 = vmax.f32 %v1748_v29, 0.0  ;;  %v1735_v36 = vadd.f32 %v1727_v34, %v1297_v50  ;;  %v1726_v37 = vsel %vm4172_vm2, %v1679_v28, 0.0 }
 0x150   : > { %v1755_v38 = vmax.f32 %v1747_v33, 0.0  ;;  %v1734_v39 = vadd.f32 %v1726_v37, %v1296_v52  ;;  %v3261_v33 = vld [vmem:[%s4357_s3 + $0x40] sm:$0xff] }
 0x151   : > { %1770 = vst.msk [vmem:[#allocation3 + $0x21] sm:$0xff] %vm1761_vm3, %v1756_v35  ;;  %v1750_v42 = vadd.f32 %v3189_v5, %v1735_v36  ;;  %v3562_v44 = vpop.f32.mrb[14].mxu0 }
 0x152   : > { %1769 = vst.msk [vmem:[#allocation3 + $0x19] sm:$0xff] %vm1761_vm3, %v1755_v38  ;;  %v1749_v45 = vadd.f32 %v3189_v5, %v1734_v39  ;;  %v1729_v46 = vsel %vm4182_vm4, %v3562_v44, 0.0  ;;  %v1689_v2 = vpop.f32.mrb[15].mxu0 }
 0x153   : > { %v1758_v47 = vmax.f32 %v1750_v42, 0.0  ;;  %v1737_v48 = vadd.f32 %v1729_v46, %v1299_v60  ;;  %v1728_v49 = vsel %vm4186_vm0, %v1689_v2, 0.0  ;;  %v3234_v60 = vld [vmem:[%s4357_s3 + $0x38] sm:$0xff]  ;;  %v2849_v42 = vld [vmem:[#allocation3 + $0x4a] sm:$0xff] }
 0x154   : > { %v1757_v43 = vmax.f32 %v1749_v45, 0.0  ;;  %v1736_v50 = vadd.f32 %v1728_v49, %v1298_v61  ;;  %v2189_v58 = vld [vmem:[#allocation3 + $0x11] sm:$0xff] }
 0x155   : > { %1772 = vst.msk [vmem:[#allocation3 + $0x31] sm:$0xff] %vm1761_vm3, %v1758_v47  ;;  %v1752_v52 = vadd.f32 %v3189_v5, %v1737_v48  ;;  %v1776_v54 = vld [vmem:[#allocation3 + $0x8] sm:$0xff]  ;;  %v4197_v56 = vld [vmem:[#allocation3 + $0x10] sm:$0xff] }
 0x156   : > { %v2188_v55 = vld [vmem:[#allocation3 + $0x9] sm:$0xff]  ;;  %1771 = vst.msk [vmem:[#allocation3 + $0x29] sm:$0xff] %vm1761_vm3, %v1757_v43  ;;  %v1751_v57 = vadd.f32 %v3189_v5, %v1736_v50  ;;  %3565 = vmatprep.mubr.msk.f32.mxu1 %vm1761_vm3, %v1776_v54 }
 0x157   : > { %3607 = vmatprep.mubr.msk.f32.mxu0 %vm1761_vm3, %v2188_v55  ;;  %v1760_v61 = vmax.f32 %v1752_v52, 0.0  ;;  %3566 = vmatmul.mubr.msk.f32.vlgmr.msra.gmra.mrb[8].mxu1 %vm1761_vm3, %v4197_v56  ;;  %v2593_v29 = vld [vmem:[#allocation3 + $0xa] sm:$0xff]  ;;  %v2592_v39 = vld [vmem:[#allocation3 + $0x2] sm:$0xff] }
 0x158   : > { %3608 = vmatmul.mubr.msk.f32.vlgmr.msra.gmra.mrb[16].mxu0 %vm1761_vm3, %v2189_v58  ;;  %v1759_v0 = vmax.f32 %v1751_v57, 0.0  ;;  %3578 = vmatpush3.msra.mxu1 %v4072_v6  ;;  %v2191_v8 = vld [vmem:[#allocation3 + $0x21] sm:$0xff] }
 0x159   : > { %3620 = vmatpush3.msra.mxu0 %v4078_v7  ;;  %1774 = vst.msk [vmem:[#allocation3 + $0x41] sm:$0xff] %vm1761_vm3, %v1760_v61  ;;  %v1778_v3 = vld [vmem:[#allocation3 + $0x18] sm:$0xff]  ;;  %v1779_v1 = vld [vmem:[#allocation3 + $0x20] sm:$0xff]  ;;  %3591 = vmatprep.subr.mxu1 %v3207_v59 }
 0x15a   : > { %v2190_v5 = vld [vmem:[#allocation3 + $0x19] sm:$0xff]  ;;  %3633 = vmatprep.subr.mxu0 %v3234_v60  ;;  %1773 = vst.msk [vmem:[#allocation3 + $0x39] sm:$0xff] %vm1761_vm3, %v1759_v0  ;;  %3568 = vmatprep.mubr.msk.f32.mxu1 %vm1761_vm3, %v1778_v3 }
 0x15b   : > { %3610 = vmatprep.mubr.msk.f32.mxu0 %vm1761_vm3, %v2190_v5  ;;  %3569 = vmatmul.mubr.msk.f32.gmra.mrb[10].mxu1 %vm1761_vm3, %v1779_v1  ;;  %v2594_v30 = vld [vmem:[#allocation3 + $0x12] sm:$0xff]  ;;  %v2595_v34 = vld [vmem:[#allocation3 + $0x1a] sm:$0xff] }
 0x15c   : > { %3611 = vmatmul.mubr.msk.f32.gmra.mrb[18].mxu0 %vm1761_vm3, %v2191_v8  ;;  %v2193_v11 = vld [vmem:[#allocation3 + $0x31] sm:$0xff] }
 0x15d   : > { %v1780_v6 = vld [vmem:[#allocation3 + $0x28] sm:$0xff]  ;;  %v1781_v9 = vld [vmem:[#allocation3 + $0x30] sm:$0xff] }
 0x15e   : > { %v2192_v7 = vld [vmem:[#allocation3 + $0x29] sm:$0xff]  ;;  %3571 = vmatprep.mubr.msk.f32.mxu1 %vm1761_vm3, %v1780_v6 }
 0x15f   : > { %3613 = vmatprep.mubr.msk.f32.mxu0 %vm1761_vm3, %v2192_v7  ;;  %3572 = vmatmul.mubr.msk.f32.gmra.mrb[12].mxu1 %vm1761_vm3, %v1781_v9  ;;  %v2596_v28 = vld [vmem:[#allocation3 + $0x22] sm:$0xff]  ;;  %v2597_v35 = vld [vmem:[#allocation3 + $0x2a] sm:$0xff] }
 0x160   : > { %3614 = vmatmul.mubr.msk.f32.gmra.mrb[20].mxu0 %vm1761_vm3, %v2193_v11  ;;  %v2197_v22 = vld [vmem:[#allocation3 + $0x41] sm:$0xff] }
 0x161   : > { %v1782_v19 = vld [vmem:[#allocation3 + $0x38] sm:$0xff]  ;;  %v1784_v21 = vld [vmem:[#allocation3 + $0x40] sm:$0xff]  ;;  %v2031_v26 = vld [vmem:[#allocation3 + $0x48] sm:$0xff] }
 0x162   : > { %v2194_v20 = vld [vmem:[#allocation3 + $0x39] sm:$0xff]  ;;  %3574 = vmatprep.mubr.msk.f32.mxu1 %vm1761_vm3, %v1782_v19  ;;  %v2602_v38 = vld [vmem:[#allocation3 + $0x42] sm:$0xff] }
 0x163   : > { %3616 = vmatprep.mubr.msk.f32.mxu0 %vm1761_vm3, %v2194_v20  ;;  %3575 = vmatmul.mubr.msk.f32.gmra.mrb[14].mxu1 %vm1761_vm3, %v1784_v21  ;;  %v2598_v36 = vld [vmem:[#allocation3 + $0x32] sm:$0xff]  ;;  %v2599_v37 = vld [vmem:[#allocation3 + $0x3a] sm:$0xff] }
 0x164   : > { %3617 = vmatmul.mubr.msk.f32.gmra.mrb[22].mxu0 %vm1761_vm3, %v2197_v22  ;;  %3579 = vmatprep.mubr.msk.f32.mxu1 %vm1761_vm3, %v1775_v13 }
 0x165   : > { %3621 = vmatprep.mubr.msk.f32.mxu0 %vm1761_vm3, %v2187_v16 }
 0x167   : > { %3580 = vmatmul.mubr.msk.f32.vlgmr.msra.gmra.mrb[8].mxu1 %vm1761_vm3, %v1776_v54 }
 0x168   : > { %3622 = vmatmul.mubr.msk.f32.vlgmr.msra.gmra.mrb[16].mxu0 %vm1761_vm3, %v2188_v55  ;;  %3592 = vmatpush3.msra.mxu1 %v3207_v59 }
 0x169   : > { %3582 = vmatprep.mubr.msk.f32.mxu1 %vm1761_vm3, %v4197_v56  ;;  %3624 = vmatprep.mubr.msk.f32.mxu0 %vm1761_vm3, %v2189_v58 }
 0x16a   : > { %3634 = vmatpush3.msra.mxu0 %v3234_v60  ;;  %3647 = vmatprep.subr.mxu1 %v3244_v23 }
 0x16b   : > { %3583 = vmatmul.mubr.msk.f32.gmra.mrb[10].mxu1 %vm1761_vm3, %v1778_v3 }
 0x16c   : > { %3625 = vmatmul.mubr.msk.f32.gmra.mrb[18].mxu0 %vm1761_vm3, %v2190_v5  ;;  %3585 = vmatprep.mubr.msk.f32.mxu1 %vm1761_vm3, %v1779_v1 }
 0x16d   : > { %3627 = vmatprep.mubr.msk.f32.mxu0 %vm1761_vm3, %v2191_v8 }
 0x16f   : > { %3586 = vmatmul.mubr.msk.f32.gmra.mrb[12].mxu1 %vm1761_vm3, %v1780_v6 }
 0x170   : > { %3628 = vmatmul.mubr.msk.f32.gmra.mrb[20].mxu0 %vm1761_vm3, %v2192_v7  ;;  %3588 = vmatprep.mubr.msk.f32.mxu1 %vm1761_vm3, %v1781_v9 }
 0x171   : > { %3630 = vmatprep.mubr.msk.f32.mxu0 %vm1761_vm3, %v2193_v11 }
 0x173   : > { %3589 = vmatmul.mubr.msk.f32.gmra.mrb[14].mxu1 %vm1761_vm3, %v1782_v19 }
 0x174   : > { %3631 = vmatmul.mubr.msk.f32.gmra.mrb[22].mxu0 %vm1761_vm3, %v2194_v20  ;;  %3593 = vmatprep.mubr.msk.f32.mxu1 %vm1761_vm3, %v4197_v56 }
 0x175   : > { %3635 = vmatprep.mubr.msk.f32.mxu0 %vm1761_vm3, %v2189_v58 }
 0x177   : > { %3594 = vmatmul.mubr.msk.f32.vlgmr.msra.gmra.mrb[8].mxu1 %vm1761_vm3, %v1778_v3 }
 0x178   : > { %3636 = vmatmul.mubr.msk.f32.vlgmr.msra.gmra.mrb[16].mxu0 %vm1761_vm3, %v2190_v5  ;;  %3648 = vmatpush3.msra.mxu1 %v3244_v23 }
 0x179   : > { %3596 = vmatprep.mubr.msk.f32.mxu1 %vm1761_vm3, %v1779_v1  ;;  %3638 = vmatprep.mubr.msk.f32.mxu0 %vm1761_vm3, %v2191_v8 }
 0x17a   : > { %3661 = vmatprep.subr.mxu1 %v3243_v14 }
 0x17b   : > { %3597 = vmatmul.mubr.msk.f32.gmra.mrb[10].mxu1 %vm1761_vm3, %v1780_v6 }
 0x17c   : > { %3639 = vmatmul.mubr.msk.f32.gmra.mrb[18].mxu0 %vm1761_vm3, %v2192_v7  ;;  %3599 = vmatprep.mubr.msk.f32.mxu1 %vm1761_vm3, %v1781_v9 }
 0x17d   : > { %3641 = vmatprep.mubr.msk.f32.mxu0 %vm1761_vm3, %v2193_v11 }
 0x17f   : > { %3600 = vmatmul.mubr.msk.f32.gmra.mrb[12].mxu1 %vm1761_vm3, %v1782_v19 }
 0x180   : > { %3642 = vmatmul.mubr.msk.f32.gmra.mrb[20].mxu0 %vm1761_vm3, %v2194_v20  ;;  %3602 = vmatprep.mubr.msk.f32.mxu1 %vm1761_vm3, %v1784_v21 }
 0x181   : > { %3644 = vmatprep.mubr.msk.f32.mxu0 %vm1761_vm3, %v2197_v22 }
 0x183   : > { %3603 = vmatmul.mubr.msk.f32.gmra.mrb[14].mxu1 %vm1761_vm3, %v2031_v26 }
 0x184   : > { %3645 = vmatmul.mubr.msk.f32.gmra.mrb[22].mxu0 %vm1761_vm3, %v2444_v18  ;;  %3649 = vmatprep.mubr.msk.f32.mxu1 %vm1761_vm3, %v2593_v29 }
 0x187   : > { %3650 = vmatmul.mubr.msk.f32.vlgmr.msra.gmra.mrb[16].mxu1 %vm1761_vm3, %v2594_v30 }
 0x188   : > { %3662 = vmatpush3.msra.mxu1 %v3243_v14  ;;  %3652 = vmatprep.mubr.msk.f32.mxu1 %vm1761_vm3, %v2595_v34 }
 0x189   : > { %3675 = vmatprep.subr.mxu1 %v3261_v33 }
 0x18b   : > { %3653 = vmatmul.mubr.msk.f32.gmra.mrb[18].mxu1 %vm1761_vm3, %v2596_v28 }
 0x18c   : > { %3655 = vmatprep.mubr.msk.f32.mxu1 %vm1761_vm3, %v2597_v35 }
 0x18f   : > { %3656 = vmatmul.mubr.msk.f32.gmra.mrb[20].mxu1 %vm1761_vm3, %v2598_v36 }
 0x190   : > { %3658 = vmatprep.mubr.msk.f32.mxu1 %vm1761_vm3, %v2599_v37 }
 0x193   : > { %3659 = vmatmul.mubr.msk.f32.gmra.mrb[22].mxu1 %vm1761_vm3, %v2602_v38 }
 0x194   : > { %3663 = vmatprep.mubr.msk.f32.mxu1 %vm1761_vm3, %v2592_v39 }
 0x197   : > { %3664 = vmatmul.mubr.msk.f32.vlgmr.msra.gmra.mrb[16].mxu1 %vm1761_vm3, %v2593_v29 }
 0x198   : > { %3676 = vmatpush3.msra.mxu1 %v3261_v33  ;;  %3666 = vmatprep.mubr.msk.f32.mxu1 %vm1761_vm3, %v2594_v30 }
 0x19b   : > { %3667 = vmatmul.mubr.msk.f32.gmra.mrb[18].mxu1 %vm1761_vm3, %v2595_v34 }
 0x19c   : > { %3669 = vmatprep.mubr.msk.f32.mxu1 %vm1761_vm3, %v2596_v28 }
 0x19f   : > { %3670 = vmatmul.mubr.msk.f32.gmra.mrb[20].mxu1 %vm1761_vm3, %v2597_v35 }
 0x1a0   : > { %3672 = vmatprep.mubr.msk.f32.mxu1 %vm1761_vm3, %v2598_v36 }
 0x1a3   : > { %3673 = vmatmul.mubr.msk.f32.gmra.mrb[22].mxu1 %vm1761_vm3, %v2599_v37 }
 0x1a4   : > { %3677 = vmatprep.mubr.msk.f32.mxu1 %vm1761_vm3, %v2594_v30 }
 0x1a7   : > { %3678 = vmatmul.mubr.msk.f32.vlgmr.msra.gmra.mrb[16].mxu1 %vm1761_vm3, %v2595_v34 }
 0x1a8   : > { %3680 = vmatprep.mubr.msk.f32.mxu1 %vm1761_vm3, %v2596_v28 }
 0x1ab   : > { %3681 = vmatmul.mubr.msk.f32.gmra.mrb[18].mxu1 %vm1761_vm3, %v2597_v35 }
 0x1ac   : > { %3683 = vmatprep.mubr.msk.f32.mxu1 %vm1761_vm3, %v2598_v36 }
 0x1af   : > { %3684 = vmatmul.mubr.msk.f32.gmra.mrb[20].mxu1 %vm1761_vm3, %v2599_v37 }
 0x1b0   : > { %3686 = vmatprep.mubr.msk.f32.mxu1 %vm1761_vm3, %v2602_v38 }
 0x1b3   : > { %3687 = vmatmul.mubr.msk.f32.gmra.mrb[22].mxu1 %vm1761_vm3, %v2849_v42 }
 0x24a   : > { %v3595_v44 = vpop.f32.mrb[8].mxu1 }
 0x24b   : > { %v3637_v45 = vpop.f32.mrb[16].mxu0  ;;  %v2172_v46 = vsel %vm4081_vm5, %v3595_v44, 0.0  ;;  %v2124_v2 = vpop.f32.mrb[9].mxu1  ;;  %vm4393_vm5 = vnez %v4384_v12 }
 0x24c   : > { %v2537_v47 = vpop.f32.mrb[17].mxu0  ;;  %v2585_v48 = vadd.f32 %v3637_v45, %v2172_v46  ;;  %v2171_v49 = vsel %vm4087_vm6, %v2124_v2, 0.0 }
 0x24d   : > { %v2584_v43 = vadd.f32 %v2537_v47, %v2171_v49 }
 0x24e   : > { %v3598_v50 = vpop.f32.mrb[10].mxu1 }
 0x24f   : > { %v3640_v52 = vpop.f32.mrb[18].mxu0  ;;  %v2174_v54 = vsel %vm4095_vm7, %v3598_v50, 0.0  ;;  %v2134_v55 = vpop.f32.mrb[11].mxu1 }
 0x250   : > { %v2547_v56 = vpop.f32.mrb[19].mxu0  ;;  %v2587_v57 = vadd.f32 %v3640_v52, %v2174_v54  ;;  %v2173_v58 = vsel %vm4104_vm8, %v2134_v55, 0.0 }
 0x251   : > { %v2586_v15 = vadd.f32 %v2547_v56, %v2173_v58 }
 0x252   : > { %v3601_v59 = vpop.f32.mrb[12].mxu1 }
 0x253   : > { %v3643_v60 = vpop.f32.mrb[20].mxu0  ;;  %v2176_v61 = vsel %vm4115_vm9, %v3601_v59, 0.0  ;;  %v2144_v17 = vpop.f32.mrb[13].mxu1 }
 0x254   : > { %v2557_v0 = vpop.f32.mrb[21].mxu0  ;;  %v2589_v3 = vadd.f32 %v3643_v60, %v2176_v61  ;;  %v2175_v25 = vsel %vm4120_vm10, %v2144_v17, 0.0 }
 0x255   : > { %v2588_v5 = vadd.f32 %v2557_v0, %v2175_v25 }
 0x256   : > { %v3604_v1 = vpop.f32.mrb[14].mxu1 }
 0x257   : > { %v3646_v8 = vpop.f32.mrb[22].mxu0  ;;  %v2178_v31 = vsel %vm4129_vm11, %v3604_v1, 0.0  ;;  %v2154_v6 = vpop.f32.mrb[15].mxu1 }
 0x258   : > { %v2567_v7 = vpop.f32.mrb[23].mxu0  ;;  %v2591_v9 = vadd.f32 %v3646_v8, %v2178_v31  ;;  %v2177_v41 = vsel %vm4133_vm12, %v2154_v6, 0.0 }
 0x259   : > { %v2590_v11 = vadd.f32 %v2567_v7, %v2177_v41 }
 0x27a   : > { %v3679_v13 = vpop.f32.mrb[16].mxu1 }
 0x27b   : > { %v2990_v16 = vsel %vm4141_vm13, %v3679_v13, 0.0  ;;  %v2942_v19 = vpop.f32.mrb[17].mxu1 }
 0x27c   : > { %v2998_v20 = vadd.f32 %v2990_v16, %v2585_v48  ;;  %v2989_v51 = vsel %vm4145_vm14, %v2942_v19, 0.0 }
 0x27d   : > { %v2997_v21 = vadd.f32 %v2989_v51, %v2584_v43 }
 0x27e   : > { %v3013_v22 = vadd.f32 %v3270_v4, %v2998_v20  ;;  %v3682_v23 = vpop.f32.mrb[18].mxu1 }
 0x27f   : > { %v3012_v53 = vadd.f32 %v3270_v4, %v2997_v21  ;;  %v2992_v62 = vsel %vm4156_vm15, %v3682_v23, 0.0  ;;  %v2952_v14 = vpop.f32.mrb[19].mxu1 }
 0x280   : > { %v3021_v18 = vmax.f32 %v3013_v22, 0.0  ;;  %v3000_v26 = vadd.f32 %v2992_v62, %v2587_v57  ;;  %v2991_v63 = vsel %vm4393_vm5, %v2952_v14, 0.0 }
 0x281   : > { %v3020_v29 = vmax.f32 %v3012_v53, 0.0  ;;  %v2999_v30 = vadd.f32 %v2991_v63, %v2586_v15 }
 0x282   : > { %3029 = vst.msk [vmem:[%s4321_s21 + $0x8] sm:$0xff] %vm1761_vm3, %v3021_v18  ;;  %v3015_v33 = vadd.f32 %v3270_v4, %v3000_v26  ;;  %v3685_v34 = vpop.f32.mrb[20].mxu1 }
 0x283   : > { %3028 = vst.msk [vmem:[%s4321_s21] sm:$0xff] %vm1761_vm3, %v3020_v29  ;;  %v3014_v28 = vadd.f32 %v3270_v4, %v2999_v30  ;;  %v2994_v10 = vsel %vm4168_vm1, %v3685_v34, 0.0  ;;  %v2962_v35 = vpop.f32.mrb[21].mxu1 }
 0x284   : > { %v3023_v36 = vmax.f32 %v3015_v33, 0.0  ;;  %v3002_v37 = vadd.f32 %v2994_v10, %v2589_v3  ;;  %v2993_v12 = vsel %vm4172_vm2, %v2962_v35, 0.0 }
 0x285   : > { %v3022_v38 = vmax.f32 %v3014_v28, 0.0  ;;  %v3001_v39 = vadd.f32 %v2993_v12, %v2588_v5 }
 0x286   : > { %3031 = vst.msk [vmem:[%s4321_s21 + $0x18] sm:$0xff] %vm1761_vm3, %v3023_v36  ;;  %v3017_v42 = vadd.f32 %v3270_v4, %v3002_v37  ;;  %v3688_v44 = vpop.f32.mrb[22].mxu1 }
 0x287   : > { %3030 = vst.msk [vmem:[%s4321_s21 + $0x10] sm:$0xff] %vm1761_vm3, %v3022_v38  ;;  %v3016_v24 = vadd.f32 %v3270_v4, %v3001_v39  ;;  %v2996_v45 = vsel %vm4182_vm4, %v3688_v44, 0.0  ;;  %v2972_v46 = vpop.f32.mrb[23].mxu1 }
 0x288   : > { %v3025_v2 = vmax.f32 %v3017_v42, 0.0  ;;  %v3004_v27 = vadd.f32 %v2996_v45, %v2591_v9  ;;  %v2995_v47 = vsel %vm4186_vm0, %v2972_v46, 0.0 }
 0x289   : > { %v3024_v48 = vmax.f32 %v3016_v24, 0.0  ;;  %v3003_v49 = vadd.f32 %v2995_v47, %v2590_v11 }
 0x28a   : > { %3033 = vst.msk [vmem:[%s4321_s21 + $0x28] sm:$0xff] %vm1761_vm3, %v3025_v2  ;;  %v3019_v43 = vadd.f32 %v3270_v4, %v3004_v27 }
 0x28b   : > { %3032 = vst.msk [vmem:[%s4321_s21 + $0x20] sm:$0xff] %vm1761_vm3, %v3024_v48  ;;  %v3018_v50 = vadd.f32 %v3270_v4, %v3003_v49 }
 0x28c   : > { %v3027_v52 = vmax.f32 %v3019_v43, 0.0 }
 0x28d   : > { %v3026_v54 = vmax.f32 %v3018_v50, 0.0 }
 0x28e   : > { %3035 = vst.msk [vmem:[%s4321_s21 + $0x38] sm:$0xff] %vm1761_vm3, %v3027_v52 }
 0x28f   : > { %3034 = vst.msk [vmem:[%s4321_s21 + $0x30] sm:$0xff] %vm1761_vm3, %v3026_v54 }
 0x290 PF: > { %s15_s18 = sadd.s32 1, %s3800_s18  }
 0x291   : > { %p12_p4 = scmp.ge.s32.totalorder %s15_s18, 4  }
 0x293   :  { %14 = sbr.rel (!%p12_p4) target bundleno = 1 (0x1), region = 86 }

</bundles_post_ra>
